<compile_context>
chip_gen: v7x
topology: tpu7x:2x2x1
jax: 0.10.0
libtpu: 0.0.40
codegen_flags: <defaults>
</compile_context>

<pallas_src>
import math
from functools import partial

import numpy as np
import jax
import jax.numpy as jnp
from jax.experimental import pallas as pl
from jax.experimental.pallas import tpu as pltpu


def _aff_kernel(x_ref, wq_ref, bq_ref, kbig_ref, trig_ref, wxc_ref, wfc_ref,
                bc_ref, o_ref, *, n_channels, n_freq, n_heads, out_dim):
    """One batch-tile (R = batch_tile * seq rows) of AdaptiveFourierFeatures."""
    D, F, H, O = n_channels, n_freq, n_heads, out_dim
    FD = F * D

    x = x_ref[...]                                                   # (R, D) f32
    R = x.shape[0]
    xb = x.astype(jnp.bfloat16)

    # fused query_proj + MHA query in-projection                      [MXU bf16]
    q = jnp.dot(xb, wq_ref[...], preferred_element_type=jnp.float32) + bq_ref[...]

    # attention logits for every (head h, frequency f, channel d)     [MXU bf16]
    # lane = h*F*D + f*D + d ; keys are head-masked, pre-scaled by 1/sqrt(hd)
    scores = jnp.dot(q.astype(jnp.bfloat16), kbig_ref[...],
                     preferred_element_type=jnp.float32)             # (R, H*F*D)

    # grouped softmax over f (per (h, d)) fused with the head average:
    # chunk-wise max/exp/sum (no (R, F*G) broadcast-backs), denominator
    # reciprocal at (R, D) on the EUP, head mean = chunked VPU accumulate.
    acc = None
    for h in range(H):
        base = h * FD
        chunks = [scores[:, base + f * D: base + (f + 1) * D] for f in range(F)]
        m = chunks[0]
        for f in range(1, F):
            m = jnp.maximum(m, chunks[f])
        es = [jnp.exp(c - m) for c in chunks]
        s = es[0]
        for f in range(1, F):
            s = s + es[f]
        inv = pl.reciprocal(s, approx=True)                          # (R, D)
        ph = [e * inv for e in es]
        acc = ph if acc is None else [a + p for a, p in zip(acc, ph)]
    attnw = jnp.concatenate(acc, axis=1) * (1.0 / H)                 # (R, F*D)

    # attention-weighted sin/cos features: duplicate the averaged weights onto
    # the [sin | cos] lane blocks and multiply by the resident trig table,
    # broadcast over the batch sub-tiles (free leading-dim split, S % 8 == 0).
    aw2 = jnp.concatenate([attnw, attnw], axis=1)                    # (R, 2FD)
    trig = trig_ref[...].astype(jnp.float32)                         # (Tr, 2FD)
    Tr = trig.shape[0]
    if Tr == R:
        ff = aw2 * trig
    else:
        ff = (aw2.reshape(R // Tr, Tr, 2 * FD) * trig[None]).reshape(R, 2 * FD)

    # gate & projection linears on [x, ff], stacked along lanes       [MXU bf16]
    pre = (jnp.dot(xb, wxc_ref[...], preferred_element_type=jnp.float32)
           + jnp.dot(ff.astype(jnp.bfloat16), wfc_ref[...],
                     preferred_element_type=jnp.float32)
           + bc_ref[...])                                            # (R, 2O)
    gate = jax.nn.sigmoid(pre[:, :O])
    z = pre[:, O:]
    o_ref[...] = (x + gate * (z * jax.nn.sigmoid(z))).astype(o_ref.dtype)


def _vmem_capacity_bytes(default=64 * 1024 * 1024):
    """Physical VMEM of the attached TPU (falls back to a v7x-safe default)."""
    try:
        info = pltpu.get_tpu_info()
        for name in ("vmem_capacity_bytes", "vmem_bytes", "vmem_capacity"):
            v = getattr(info, name, None)
            if v:
                return int(v)
    except Exception:
        pass
    return default


def adaptive_fourier_features_pallas(x, params, *, num_heads, batch_tile=None):
    """Forward pass of AdaptiveFourierFeatures (eval mode) via one Pallas kernel."""
    x = jnp.asarray(x, jnp.float32)
    B, S, D = x.shape
    f32, bf16 = jnp.float32, jnp.bfloat16

    freq_matrix = jnp.asarray(params["freq_matrix"], f32)            # (D, F)
    freq_scale = jnp.asarray(params["freq_scale"], f32)              # (D, F)
    phase = jnp.asarray(params["phase"], f32)                        # (D, F)
    wqp = jnp.asarray(params["w_query"], f32)                        # (A, D)
    bqp = jnp.asarray(params["b_query"], f32)                        # (A,)
    wkl = jnp.asarray(params["w_key"], f32)                          # (A, 1)
    bkl = jnp.asarray(params["b_key"], f32)                          # (A,)
    wqi = jnp.asarray(params["w_attn_q"], f32)                       # (A, A)
    bqi = jnp.asarray(params["b_attn_q"], f32)                       # (A,)
    wki = jnp.asarray(params["w_attn_k"], f32)                       # (A, A)
    bki = jnp.asarray(params["b_attn_k"], f32)                       # (A,)
    wg = jnp.asarray(params["w_gate"], f32)                          # (O, D+2DF)
    bg = jnp.asarray(params["b_gate"], f32)                          # (O,)
    wp = jnp.asarray(params["w_proj"], f32)                          # (O, D+2DF)
    bp = jnp.asarray(params["b_proj"], f32)                          # (O,)

    F = freq_matrix.shape[1]
    A = wqp.shape[0]
    H = num_heads
    assert A % H == 0
    hd = A // H
    O = wg.shape[0]
    assert O == D, "residual `x + gated` requires output_size == input_size"
    FD = F * D
    FG = H * FD                                                      # logits width

    # ---------- x-independent precompute (folded into lane-dense operands) ----------
    freqs = freq_matrix * freq_scale                                 # (D, F)

    # trig table in (sin|cos, f, d) lane order: the head-averaged attention
    # weights (lane = f*D + d) get lane-duplicated and multiplied directly, so
    # the old (F*G, 2DF) ~99%-zero scatter matmul disappears.
    t = jnp.linspace(0.0, 1.0, S, dtype=f32)
    sig = 2.0 * jnp.pi * t[:, None, None] * freqs[None] + phase[None]   # (S, D, F)
    sin_fd = jnp.sin(sig).transpose(0, 2, 1).reshape(S, FD)             # lane = f*D+d
    cos_fd = jnp.cos(sig).transpose(0, 2, 1).reshape(S, FD)
    trig = jnp.concatenate([sin_fd, cos_fd], axis=1)                    # (S, 2FD)

    # fused query_proj + MHA query in-projection (bf16 MXU operand)
    wq_comb = (wqi @ wqp).T.astype(bf16)                                # (D, A)
    bq_comb = (wqi @ bqp + bqi)[None, :]                                # (1, A) f32

    # per-(channel, frequency) keys -> head-masked, pre-scaled key matrix with
    # column order (h, f, d): softmax over f is a D-wide chunk reduce and the
    # head average is an F*D-wide chunk add inside the kernel.
    keys = freqs[:, :, None] * wkl[None, None, :, 0] + bkl              # (D, F, A)
    k_mha = jnp.einsum("dfa,ba->dfb", keys, wki) + bki                  # (D, F, A)
    k_heads = k_mha.reshape(D, F, H, hd)
    eye_h = jnp.eye(H, dtype=f32)
    kbig = jnp.einsum("dfhe,hg->hfdge", k_heads, eye_h) / float(np.sqrt(hd))
    kbigT = kbig.reshape(FG, A).T.astype(bf16)                          # (A, F*G)

    # gate / projection linears: split concat([x, ff]) into an x-part and a
    # fourier-part, stack (gate, proj) along lanes, and permute the fourier
    # rows from the module's (d, sin|cos, f) order to our (sin|cos, f, d) order.
    d_idx = np.arange(D)
    f_idx = np.arange(F)
    nat = (d_idx[None, :] * (2 * F) + f_idx[:, None]).reshape(-1)       # (F*D,)
    perm = np.concatenate([nat, nat + F])                               # (2FD,)
    wxc = jnp.concatenate([wg[:, :D].T, wp[:, :D].T], axis=1).astype(bf16)   # (D, 2O)
    wfc = jnp.concatenate([wg[:, D:].T, wp[:, D:].T], axis=1)[perm, :]
    wfc = wfc.astype(bf16)                                              # (2FD, 2O)
    bc = jnp.concatenate([bg, bp])[None, :]                             # (1, 2O) f32

    # ---------- VMEM-budget-driven row tiling over flattened (B*S) rows ----------
    vmem_limit = int(min(100 * 2 ** 20, (_vmem_capacity_bytes() * 3) // 4))
    gran = 8 // math.gcd(S, 8)                 # smallest tile keeping R % 8 == 0
    if batch_tile is None:
        per_row = 4 * (2 * (D + O)             # double-buffered x / out blocks
                       + FG                    # attention logits
                       + 3 * FD                # exp chunks + head-avg accumulators
                       + 4 * FD                # fourier features (+ bf16 copy, slack)
                       + 2 * O)                # gate/proj pre-activations
        bt_budget = max(1, (vmem_limit // 2) // (per_row * S))
        bt_target = max(1, 512 // S)           # ~512-row tiles amortize grid overhead
        bt = max(gran, (min(bt_budget, bt_target) // gran) * gran)
        bt = min(bt, pl.cdiv(B, gran) * gran)  # don't tile past the (rounded) batch
        if B // bt < 2 and bt > gran:          # keep >= 2 grid steps (v7x megacore)
            bt = max(gran, (pl.cdiv(B, 2) // gran) * gran)
        batch_tile = bt
    R = batch_tile * S
    assert R % 8 == 0 or R == B * S, "row tile must be a multiple of 8"
    B_pad = pl.cdiv(B, batch_tile) * batch_tile
    grid = B_pad // batch_tile

    x2d = x.reshape(B * S, D)
    if B_pad != B:                             # pad instead of shrinking the tile
        x2d = jnp.concatenate([x2d, jnp.zeros(((B_pad - B) * S, D), f32)], axis=0)

    # trig stays a single (S, 2FD) resident block (broadcast in-kernel) whenever
    # the free leading-dim split is legal; otherwise one row-tile-sized copy.
    if S % 8 == 0:
        trig_arr = trig.astype(bf16)                                    # (S, 2FD)
    else:
        trig_arr = jnp.tile(trig, (batch_tile, 1)).astype(bf16)         # (R, 2FD)
    Tr = trig_arr.shape[0]

    resident = (wq_comb.nbytes + bq_comb.nbytes + kbigT.nbytes + trig_arr.nbytes
                + wxc.nbytes + wfc.nbytes + bc.nbytes)
    assert 2 * resident < vmem_limit, (
        f"resident operands ({2 * resident} B incl. buffering) exceed the "
        f"{vmem_limit} B VMEM limit; reduce num_frequencies / input_size")

    kernel = partial(_aff_kernel, n_channels=D, n_freq=F, n_heads=H, out_dim=O)
    inv = lambda b: (0, 0)   # resident operands: constant block index -> single fetch

    # TODO(synk): with the tiny demo sizes the (R, O=4) output block is a masked
    # store (only 4/128 lanes used); real configs should keep D / 2*O lane-dense.
    grid_spec = pltpu.PrefetchScalarGridSpec(
        num_scalar_prefetch=0,
        grid=(grid,),
        in_specs=[
            pl.BlockSpec((R, D), lambda b: (b, 0)),                     # x rows
            pl.BlockSpec((D, A), inv),                                  # wq_comb (bf16)
            pl.BlockSpec((1, A), inv),                                  # bq_comb
            pl.BlockSpec((A, FG), inv),                                 # kbigT   (bf16)
            pl.BlockSpec((Tr, 2 * FD), inv),                            # trig    (bf16)
            pl.BlockSpec((D, 2 * O), inv),                              # wxc     (bf16)
            pl.BlockSpec((2 * FD, 2 * O), inv),                         # wfc     (bf16)
            pl.BlockSpec((1, 2 * O), inv),                              # bc
        ],
        out_specs=pl.BlockSpec((R, O), lambda b: (b, 0)),
    )
    out2d = pl.pallas_call(
        kernel,
        out_shape=jax.ShapeDtypeStruct((B_pad * S, O), jnp.float32),
        grid_spec=grid_spec,
        compiler_params=pltpu.CompilerParams(
            dimension_semantics=("parallel",),
            vmem_limit_bytes=vmem_limit,
        ),
    )(x2d, wq_comb, bq_comb, kbigT, trig_arr, wxc, wfc, bc)
    return out2d[: B * S].reshape(B, S, O)


def _reference_forward(x, p, num_heads):
    """float64 numpy port of AdaptiveFourierFeatures.forward (eval mode)."""
    x = np.asarray(x, np.float64)
    B, S, D = x.shape
    fm = np.asarray(p["freq_matrix"], np.float64)
    fs = np.asarray(p["freq_scale"], np.float64)
    ph = np.asarray(p["phase"], np.float64)
    wqp, bqp = np.asarray(p["w_query"], np.float64), np.asarray(p["b_query"], np.float64)
    wkl, bkl = np.asarray(p["w_key"], np.float64), np.asarray(p["b_key"], np.float64)
    wqi, bqi = np.asarray(p["w_attn_q"], np.float64), np.asarray(p["b_attn_q"], np.float64)
    wki, bki = np.asarray(p["w_attn_k"], np.float64), np.asarray(p["b_attn_k"], np.float64)
    wg, bg = np.asarray(p["w_gate"], np.float64), np.asarray(p["b_gate"], np.float64)
    wp, bp = np.asarray(p["w_proj"], np.float64), np.asarray(p["b_proj"], np.float64)
    F = fm.shape[1]
    A = wqp.shape[0]
    H = num_heads
    hd = A // H

    sigmoid = lambda z: 1.0 / (1.0 + np.exp(-z))
    t = np.linspace(0.0, 1.0, S)
    queries = x @ wqp.T + bqp                                   # query_proj(x)
    q_mha = queries @ wqi.T + bqi                               # MHA q in-proj

    ff_list = []
    for i in range(D):
        freqs_i = fm[i] * fs[i]                                 # (F,)
        signal = 2 * np.pi * t[None, :, None] * freqs_i[None, None, :] + ph[i][None, None, :]
        sinf, cosf = np.sin(signal), np.cos(signal)             # (1, S, F)
        keys = freqs_i[:, None] @ wkl.T + bkl                   # key_proj  (F, A)
        k_mha = keys @ wki.T + bki                              # MHA k in-proj
        qh = q_mha.reshape(B, S, H, hd)
        kh = k_mha.reshape(F, H, hd)
        sc = np.einsum("bshe,fhe->bhsf", qh, kh) / np.sqrt(hd)
        sc = sc - sc.max(axis=-1, keepdims=True)
        e = np.exp(sc)
        pr = e / e.sum(axis=-1, keepdims=True)
        attnw = pr.mean(axis=1)                                 # head-avg (B, S, F)
        ff_list.append(np.concatenate([sinf * attnw, cosf * attnw], axis=-1))
    ff = np.concatenate(ff_list, axis=2)                        # (B, S, 2*D*F)
    ci = np.concatenate([x, ff], axis=2)
    gate = sigmoid(ci @ wg.T + bg)
    z = ci @ wp.T + bp
    proj = z * sigmoid(z)                                       # SiLU
    return x + gated_sum(x, gate, proj) - x if False else x + gate * proj


def gated_sum(x, gate, proj):  # kept trivial; avoids confusing the reader above
    return gate * proj


if __name__ == "__main__":
    B, S = 2, 16
    D = 4          # input_size
    O = 4          # output_size (== input_size so the residual add is valid)
    F = 16         # num_frequencies
    A = 32         # attention_dim
    H = 4          # freq_attention_heads

    key = jax.random.PRNGKey(0)
    ks = jax.random.split(key, 14)
    normal = lambda k, shape, s: s * jax.random.normal(k, shape, dtype=jnp.float32)

    cdim = D + 2 * D * F
    params = {
        "freq_matrix": jnp.tile(jnp.linspace(1.0, 10.0, F, dtype=jnp.float32)[None, :], (D, 1)),
        "freq_scale": jnp.ones((D, F), jnp.float32),
        "phase": normal(ks[0], (D, F), 1.0),
        "w_query": normal(ks[1], (A, D), 1.0 / math.sqrt(D)),
        "b_query": normal(ks[2], (A,), 0.1),
        "w_key": normal(ks[3], (A, 1), 0.3),
        "b_key": normal(ks[4], (A,), 0.1),
        "w_attn_q": normal(ks[5], (A, A), 1.0 / math.sqrt(A)),
        "b_attn_q": normal(ks[6], (A,), 0.1),
        "w_attn_k": normal(ks[7], (A, A), 1.0 / math.sqrt(A)),
        "b_attn_k": normal(ks[8], (A,), 0.1),
        "w_gate": normal(ks[9], (O, cdim), 1.0 / math.sqrt(cdim)),
        "b_gate": normal(ks[10], (O,), 0.1),
        "w_proj": normal(ks[11], (O, cdim), 1.0 / math.sqrt(cdim)),
        "b_proj": normal(ks[12], (O,), 0.1),
    }
    x = normal(ks[13], (B, S, D), 1.0)

    out = adaptive_fourier_features_pallas(x, params, num_heads=H)
    out = jax.block_until_ready(out)

    ref = _reference_forward(np.asarray(x), {k: np.asarray(v) for k, v in params.items()}, H)
    assert out.shape == (B, S, O)
    # bf16 MXU operands + approx reciprocal -> looser tolerance than the f32 build.
    np.testing.assert_allclose(np.asarray(out), ref, rtol=5e-2, atol=5e-2)
    print("KERNEL_OK")
</pallas_src>

<mosaic_0001>
module attributes {stable_mosaic.version = 11 : i64} {
  func.func @_aff_kernel(%arg0: i32, %arg1: memref<16x4xf32, #tpu.memory_space<vmem>>, %arg2: memref<4x32xbf16, #tpu.memory_space<vmem>>, %arg3: memref<1x32xf32, #tpu.memory_space<vmem>>, %arg4: memref<32x256xbf16, #tpu.memory_space<vmem>>, %arg5: memref<16x128xbf16, #tpu.memory_space<vmem>>, %arg6: memref<4x8xbf16, #tpu.memory_space<vmem>>, %arg7: memref<128x8xbf16, #tpu.memory_space<vmem>>, %arg8: memref<1x8xf32, #tpu.memory_space<vmem>>, %arg9: memref<16x4xf32, #tpu.memory_space<vmem>>) attributes {dimension_semantics = [#tpu.dimension_semantics<parallel>], iteration_bounds = array<i64: 2>, scalar_prefetch = 0 : i64, scratch_operands = 0 : i64, tpu.core_type = #tpu.core_type<tc>, window_params = [{transform_indices = @transform_0, window_bounds = array<i64: 16, 4>}, {pipeline_mode = #tpu.pipeline_mode<synchronous>, transform_indices = @transform_1, window_bounds = array<i64: 4, 32>}, {pipeline_mode = #tpu.pipeline_mode<synchronous>, transform_indices = @transform_2, window_bounds = array<i64: 1, 32>}, {pipeline_mode = #tpu.pipeline_mode<synchronous>, transform_indices = @transform_3, window_bounds = array<i64: 32, 256>}, {pipeline_mode = #tpu.pipeline_mode<synchronous>, transform_indices = @transform_4, window_bounds = array<i64: 16, 128>}, {pipeline_mode = #tpu.pipeline_mode<synchronous>, transform_indices = @transform_5, window_bounds = array<i64: 4, 8>}, {pipeline_mode = #tpu.pipeline_mode<synchronous>, transform_indices = @transform_6, window_bounds = array<i64: 128, 8>}, {pipeline_mode = #tpu.pipeline_mode<synchronous>, transform_indices = @transform_7, window_bounds = array<i64: 1, 8>}, {transform_indices = @transform_8, window_bounds = array<i64: 16, 4>}]} {
    %c0 = arith.constant 0 : index
    %c0_0 = arith.constant 0 : index
    %0 = vector.load %arg1[%c0, %c0_0] : memref<16x4xf32, #tpu.memory_space<vmem>>, vector<16x4xf32>
    %1 = arith.truncf %0 : vector<16x4xf32> to vector<16x4xbf16>
    %c0_1 = arith.constant 0 : index
    %c0_2 = arith.constant 0 : index
    %2 = vector.load %arg2[%c0_1, %c0_2] : memref<4x32xbf16, #tpu.memory_space<vmem>>, vector<4x32xbf16>
    %cst = arith.constant dense<0.000000e+00> : vector<16x32xf32>
    %3 = tpu.matmul %1, %2, %cst {dimension_numbers = #tpu.dot_dimension_numbers<[1], [0], [0], [1], [0, 0, 1, 1], [], []>} : vector<16x4xbf16>, vector<4x32xbf16>, vector<16x32xf32> -> vector<16x32xf32>
    %c0_3 = arith.constant 0 : index
    %c0_4 = arith.constant 0 : index
    %4 = vector.load %arg3[%c0_3, %c0_4] : memref<1x32xf32, #tpu.memory_space<vmem>>, vector<1x32xf32>
    %5 = vector.broadcast %4 : vector<1x32xf32> to vector<16x32xf32>
    %6 = arith.addf %3, %5 : vector<16x32xf32>
    %7 = arith.truncf %6 : vector<16x32xf32> to vector<16x32xbf16>
    %c0_5 = arith.constant 0 : index
    %c0_6 = arith.constant 0 : index
    %8 = vector.load %arg4[%c0_5, %c0_6] : memref<32x256xbf16, #tpu.memory_space<vmem>>, vector<32x256xbf16>
    %cst_7 = arith.constant dense<0.000000e+00> : vector<16x256xf32>
    %9 = tpu.matmul %7, %8, %cst_7 {dimension_numbers = #tpu.dot_dimension_numbers<[1], [0], [0], [1], [0, 0, 1, 1], [], []>} : vector<16x32xbf16>, vector<32x256xbf16>, vector<16x256xf32> -> vector<16x256xf32>
    %10 = vector.extract_strided_slice %9 {offsets = [0, 0], sizes = [16, 4], strides = [1, 1]} : vector<16x256xf32> to vector<16x4xf32>
    %11 = vector.extract_strided_slice %9 {offsets = [0, 4], sizes = [16, 4], strides = [1, 1]} : vector<16x256xf32> to vector<16x4xf32>
    %12 = vector.extract_strided_slice %9 {offsets = [0, 8], sizes = [16, 4], strides = [1, 1]} : vector<16x256xf32> to vector<16x4xf32>
    %13 = vector.extract_strided_slice %9 {offsets = [0, 12], sizes = [16, 4], strides = [1, 1]} : vector<16x256xf32> to vector<16x4xf32>
    %14 = vector.extract_strided_slice %9 {offsets = [0, 16], sizes = [16, 4], strides = [1, 1]} : vector<16x256xf32> to vector<16x4xf32>
    %15 = vector.extract_strided_slice %9 {offsets = [0, 20], sizes = [16, 4], strides = [1, 1]} : vector<16x256xf32> to vector<16x4xf32>
    %16 = vector.extract_strided_slice %9 {offsets = [0, 24], sizes = [16, 4], strides = [1, 1]} : vector<16x256xf32> to vector<16x4xf32>
    %17 = vector.extract_strided_slice %9 {offsets = [0, 28], sizes = [16, 4], strides = [1, 1]} : vector<16x256xf32> to vector<16x4xf32>
    %18 = vector.extract_strided_slice %9 {offsets = [0, 32], sizes = [16, 4], strides = [1, 1]} : vector<16x256xf32> to vector<16x4xf32>
    %19 = vector.extract_strided_slice %9 {offsets = [0, 36], sizes = [16, 4], strides = [1, 1]} : vector<16x256xf32> to vector<16x4xf32>
    %20 = vector.extract_strided_slice %9 {offsets = [0, 40], sizes = [16, 4], strides = [1, 1]} : vector<16x256xf32> to vector<16x4xf32>
    %21 = vector.extract_strided_slice %9 {offsets = [0, 44], sizes = [16, 4], strides = [1, 1]} : vector<16x256xf32> to vector<16x4xf32>
    %22 = vector.extract_strided_slice %9 {offsets = [0, 48], sizes = [16, 4], strides = [1, 1]} : vector<16x256xf32> to vector<16x4xf32>
    %23 = vector.extract_strided_slice %9 {offsets = [0, 52], sizes = [16, 4], strides = [1, 1]} : vector<16x256xf32> to vector<16x4xf32>
    %24 = vector.extract_strided_slice %9 {offsets = [0, 56], sizes = [16, 4], strides = [1, 1]} : vector<16x256xf32> to vector<16x4xf32>
    %25 = vector.extract_strided_slice %9 {offsets = [0, 60], sizes = [16, 4], strides = [1, 1]} : vector<16x256xf32> to vector<16x4xf32>
    %26 = arith.maximumf %10, %11 : vector<16x4xf32>
    %27 = arith.maximumf %26, %12 : vector<16x4xf32>
    %28 = arith.maximumf %27, %13 : vector<16x4xf32>
    %29 = arith.maximumf %28, %14 : vector<16x4xf32>
    %30 = arith.maximumf %29, %15 : vector<16x4xf32>
    %31 = arith.maximumf %30, %16 : vector<16x4xf32>
    %32 = arith.maximumf %31, %17 : vector<16x4xf32>
    %33 = arith.maximumf %32, %18 : vector<16x4xf32>
    %34 = arith.maximumf %33, %19 : vector<16x4xf32>
    %35 = arith.maximumf %34, %20 : vector<16x4xf32>
    %36 = arith.maximumf %35, %21 : vector<16x4xf32>
    %37 = arith.maximumf %36, %22 : vector<16x4xf32>
    %38 = arith.maximumf %37, %23 : vector<16x4xf32>
    %39 = arith.maximumf %38, %24 : vector<16x4xf32>
    %40 = arith.maximumf %39, %25 : vector<16x4xf32>
    %41 = arith.subf %10, %40 : vector<16x4xf32>
    %42 = math.exp %41 : vector<16x4xf32>
    %43 = arith.subf %11, %40 : vector<16x4xf32>
    %44 = math.exp %43 : vector<16x4xf32>
    %45 = arith.subf %12, %40 : vector<16x4xf32>
    %46 = math.exp %45 : vector<16x4xf32>
    %47 = arith.subf %13, %40 : vector<16x4xf32>
    %48 = math.exp %47 : vector<16x4xf32>
    %49 = arith.subf %14, %40 : vector<16x4xf32>
    %50 = math.exp %49 : vector<16x4xf32>
    %51 = arith.subf %15, %40 : vector<16x4xf32>
    %52 = math.exp %51 : vector<16x4xf32>
    %53 = arith.subf %16, %40 : vector<16x4xf32>
    %54 = math.exp %53 : vector<16x4xf32>
    %55 = arith.subf %17, %40 : vector<16x4xf32>
    %56 = math.exp %55 : vector<16x4xf32>
    %57 = arith.subf %18, %40 : vector<16x4xf32>
    %58 = math.exp %57 : vector<16x4xf32>
    %59 = arith.subf %19, %40 : vector<16x4xf32>
    %60 = math.exp %59 : vector<16x4xf32>
    %61 = arith.subf %20, %40 : vector<16x4xf32>
    %62 = math.exp %61 : vector<16x4xf32>
    %63 = arith.subf %21, %40 : vector<16x4xf32>
    %64 = math.exp %63 : vector<16x4xf32>
    %65 = arith.subf %22, %40 : vector<16x4xf32>
    %66 = math.exp %65 : vector<16x4xf32>
    %67 = arith.subf %23, %40 : vector<16x4xf32>
    %68 = math.exp %67 : vector<16x4xf32>
    %69 = arith.subf %24, %40 : vector<16x4xf32>
    %70 = math.exp %69 : vector<16x4xf32>
    %71 = arith.subf %25, %40 : vector<16x4xf32>
    %72 = math.exp %71 : vector<16x4xf32>
    %73 = arith.addf %42, %44 : vector<16x4xf32>
    %74 = arith.addf %73, %46 : vector<16x4xf32>
    %75 = arith.addf %74, %48 : vector<16x4xf32>
    %76 = arith.addf %75, %50 : vector<16x4xf32>
    %77 = arith.addf %76, %52 : vector<16x4xf32>
    %78 = arith.addf %77, %54 : vector<16x4xf32>
    %79 = arith.addf %78, %56 : vector<16x4xf32>
    %80 = arith.addf %79, %58 : vector<16x4xf32>
    %81 = arith.addf %80, %60 : vector<16x4xf32>
    %82 = arith.addf %81, %62 : vector<16x4xf32>
    %83 = arith.addf %82, %64 : vector<16x4xf32>
    %84 = arith.addf %83, %66 : vector<16x4xf32>
    %85 = arith.addf %84, %68 : vector<16x4xf32>
    %86 = arith.addf %85, %70 : vector<16x4xf32>
    %87 = arith.addf %86, %72 : vector<16x4xf32>
    %88 = tpu.reciprocal %87 {approx = true} : vector<16x4xf32> -> vector<16x4xf32>
    %89 = arith.mulf %42, %88 : vector<16x4xf32>
    %90 = arith.mulf %44, %88 : vector<16x4xf32>
    %91 = arith.mulf %46, %88 : vector<16x4xf32>
    %92 = arith.mulf %48, %88 : vector<16x4xf32>
    %93 = arith.mulf %50, %88 : vector<16x4xf32>
    %94 = arith.mulf %52, %88 : vector<16x4xf32>
    %95 = arith.mulf %54, %88 : vector<16x4xf32>
    %96 = arith.mulf %56, %88 : vector<16x4xf32>
    %97 = arith.mulf %58, %88 : vector<16x4xf32>
    %98 = arith.mulf %60, %88 : vector<16x4xf32>
    %99 = arith.mulf %62, %88 : vector<16x4xf32>
    %100 = arith.mulf %64, %88 : vector<16x4xf32>
    %101 = arith.mulf %66, %88 : vector<16x4xf32>
    %102 = arith.mulf %68, %88 : vector<16x4xf32>
    %103 = arith.mulf %70, %88 : vector<16x4xf32>
    %104 = arith.mulf %72, %88 : vector<16x4xf32>
    %105 = vector.extract_strided_slice %9 {offsets = [0, 64], sizes = [16, 4], strides = [1, 1]} : vector<16x256xf32> to vector<16x4xf32>
    %106 = vector.extract_strided_slice %9 {offsets = [0, 68], sizes = [16, 4], strides = [1, 1]} : vector<16x256xf32> to vector<16x4xf32>
    %107 = vector.extract_strided_slice %9 {offsets = [0, 72], sizes = [16, 4], strides = [1, 1]} : vector<16x256xf32> to vector<16x4xf32>
    %108 = vector.extract_strided_slice %9 {offsets = [0, 76], sizes = [16, 4], strides = [1, 1]} : vector<16x256xf32> to vector<16x4xf32>
    %109 = vector.extract_strided_slice %9 {offsets = [0, 80], sizes = [16, 4], strides = [1, 1]} : vector<16x256xf32> to vector<16x4xf32>
    %110 = vector.extract_strided_slice %9 {offsets = [0, 84], sizes = [16, 4], strides = [1, 1]} : vector<16x256xf32> to vector<16x4xf32>
    %111 = vector.extract_strided_slice %9 {offsets = [0, 88], sizes = [16, 4], strides = [1, 1]} : vector<16x256xf32> to vector<16x4xf32>
    %112 = vector.extract_strided_slice %9 {offsets = [0, 92], sizes = [16, 4], strides = [1, 1]} : vector<16x256xf32> to vector<16x4xf32>
    %113 = vector.extract_strided_slice %9 {offsets = [0, 96], sizes = [16, 4], strides = [1, 1]} : vector<16x256xf32> to vector<16x4xf32>
    %114 = vector.extract_strided_slice %9 {offsets = [0, 100], sizes = [16, 4], strides = [1, 1]} : vector<16x256xf32> to vector<16x4xf32>
    %115 = vector.extract_strided_slice %9 {offsets = [0, 104], sizes = [16, 4], strides = [1, 1]} : vector<16x256xf32> to vector<16x4xf32>
    %116 = vector.extract_strided_slice %9 {offsets = [0, 108], sizes = [16, 4], strides = [1, 1]} : vector<16x256xf32> to vector<16x4xf32>
    %117 = vector.extract_strided_slice %9 {offsets = [0, 112], sizes = [16, 4], strides = [1, 1]} : vector<16x256xf32> to vector<16x4xf32>
    %118 = vector.extract_strided_slice %9 {offsets = [0, 116], sizes = [16, 4], strides = [1, 1]} : vector<16x256xf32> to vector<16x4xf32>
    %119 = vector.extract_strided_slice %9 {offsets = [0, 120], sizes = [16, 4], strides = [1, 1]} : vector<16x256xf32> to vector<16x4xf32>
    %120 = vector.extract_strided_slice %9 {offsets = [0, 124], sizes = [16, 4], strides = [1, 1]} : vector<16x256xf32> to vector<16x4xf32>
    %121 = arith.maximumf %105, %106 : vector<16x4xf32>
    %122 = arith.maximumf %121, %107 : vector<16x4xf32>
    %123 = arith.maximumf %122, %108 : vector<16x4xf32>
    %124 = arith.maximumf %123, %109 : vector<16x4xf32>
    %125 = arith.maximumf %124, %110 : vector<16x4xf32>
    %126 = arith.maximumf %125, %111 : vector<16x4xf32>
    %127 = arith.maximumf %126, %112 : vector<16x4xf32>
    %128 = arith.maximumf %127, %113 : vector<16x4xf32>
    %129 = arith.maximumf %128, %114 : vector<16x4xf32>
    %130 = arith.maximumf %129, %115 : vector<16x4xf32>
    %131 = arith.maximumf %130, %116 : vector<16x4xf32>
    %132 = arith.maximumf %131, %117 : vector<16x4xf32>
    %133 = arith.maximumf %132, %118 : vector<16x4xf32>
    %134 = arith.maximumf %133, %119 : vector<16x4xf32>
    %135 = arith.maximumf %134, %120 : vector<16x4xf32>
    %136 = arith.subf %105, %135 : vector<16x4xf32>
    %137 = math.exp %136 : vector<16x4xf32>
    %138 = arith.subf %106, %135 : vector<16x4xf32>
    %139 = math.exp %138 : vector<16x4xf32>
    %140 = arith.subf %107, %135 : vector<16x4xf32>
    %141 = math.exp %140 : vector<16x4xf32>
    %142 = arith.subf %108, %135 : vector<16x4xf32>
    %143 = math.exp %142 : vector<16x4xf32>
    %144 = arith.subf %109, %135 : vector<16x4xf32>
    %145 = math.exp %144 : vector<16x4xf32>
    %146 = arith.subf %110, %135 : vector<16x4xf32>
    %147 = math.exp %146 : vector<16x4xf32>
    %148 = arith.subf %111, %135 : vector<16x4xf32>
    %149 = math.exp %148 : vector<16x4xf32>
    %150 = arith.subf %112, %135 : vector<16x4xf32>
    %151 = math.exp %150 : vector<16x4xf32>
    %152 = arith.subf %113, %135 : vector<16x4xf32>
    %153 = math.exp %152 : vector<16x4xf32>
    %154 = arith.subf %114, %135 : vector<16x4xf32>
    %155 = math.exp %154 : vector<16x4xf32>
    %156 = arith.subf %115, %135 : vector<16x4xf32>
    %157 = math.exp %156 : vector<16x4xf32>
    %158 = arith.subf %116, %135 : vector<16x4xf32>
    %159 = math.exp %158 : vector<16x4xf32>
    %160 = arith.subf %117, %135 : vector<16x4xf32>
    %161 = math.exp %160 : vector<16x4xf32>
    %162 = arith.subf %118, %135 : vector<16x4xf32>
    %163 = math.exp %162 : vector<16x4xf32>
    %164 = arith.subf %119, %135 : vector<16x4xf32>
    %165 = math.exp %164 : vector<16x4xf32>
    %166 = arith.subf %120, %135 : vector<16x4xf32>
    %167 = math.exp %166 : vector<16x4xf32>
    %168 = arith.addf %137, %139 : vector<16x4xf32>
    %169 = arith.addf %168, %141 : vector<16x4xf32>
    %170 = arith.addf %169, %143 : vector<16x4xf32>
    %171 = arith.addf %170, %145 : vector<16x4xf32>
    %172 = arith.addf %171, %147 : vector<16x4xf32>
    %173 = arith.addf %172, %149 : vector<16x4xf32>
    %174 = arith.addf %173, %151 : vector<16x4xf32>
    %175 = arith.addf %174, %153 : vector<16x4xf32>
    %176 = arith.addf %175, %155 : vector<16x4xf32>
    %177 = arith.addf %176, %157 : vector<16x4xf32>
    %178 = arith.addf %177, %159 : vector<16x4xf32>
    %179 = arith.addf %178, %161 : vector<16x4xf32>
    %180 = arith.addf %179, %163 : vector<16x4xf32>
    %181 = arith.addf %180, %165 : vector<16x4xf32>
    %182 = arith.addf %181, %167 : vector<16x4xf32>
    %183 = tpu.reciprocal %182 {approx = true} : vector<16x4xf32> -> vector<16x4xf32>
    %184 = arith.mulf %137, %183 : vector<16x4xf32>
    %185 = arith.mulf %139, %183 : vector<16x4xf32>
    %186 = arith.mulf %141, %183 : vector<16x4xf32>
    %187 = arith.mulf %143, %183 : vector<16x4xf32>
    %188 = arith.mulf %145, %183 : vector<16x4xf32>
    %189 = arith.mulf %147, %183 : vector<16x4xf32>
    %190 = arith.mulf %149, %183 : vector<16x4xf32>
    %191 = arith.mulf %151, %183 : vector<16x4xf32>
    %192 = arith.mulf %153, %183 : vector<16x4xf32>
    %193 = arith.mulf %155, %183 : vector<16x4xf32>
    %194 = arith.mulf %157, %183 : vector<16x4xf32>
    %195 = arith.mulf %159, %183 : vector<16x4xf32>
    %196 = arith.mulf %161, %183 : vector<16x4xf32>
    %197 = arith.mulf %163, %183 : vector<16x4xf32>
    %198 = arith.mulf %165, %183 : vector<16x4xf32>
    %199 = arith.mulf %167, %183 : vector<16x4xf32>
    %200 = arith.addf %89, %184 : vector<16x4xf32>
    %201 = arith.addf %90, %185 : vector<16x4xf32>
    %202 = arith.addf %91, %186 : vector<16x4xf32>
    %203 = arith.addf %92, %187 : vector<16x4xf32>
    %204 = arith.addf %93, %188 : vector<16x4xf32>
    %205 = arith.addf %94, %189 : vector<16x4xf32>
    %206 = arith.addf %95, %190 : vector<16x4xf32>
    %207 = arith.addf %96, %191 : vector<16x4xf32>
    %208 = arith.addf %97, %192 : vector<16x4xf32>
    %209 = arith.addf %98, %193 : vector<16x4xf32>
    %210 = arith.addf %99, %194 : vector<16x4xf32>
    %211 = arith.addf %100, %195 : vector<16x4xf32>
    %212 = arith.addf %101, %196 : vector<16x4xf32>
    %213 = arith.addf %102, %197 : vector<16x4xf32>
    %214 = arith.addf %103, %198 : vector<16x4xf32>
    %215 = arith.addf %104, %199 : vector<16x4xf32>
    %216 = vector.extract_strided_slice %9 {offsets = [0, 128], sizes = [16, 4], strides = [1, 1]} : vector<16x256xf32> to vector<16x4xf32>
    %217 = vector.extract_strided_slice %9 {offsets = [0, 132], sizes = [16, 4], strides = [1, 1]} : vector<16x256xf32> to vector<16x4xf32>
    %218 = vector.extract_strided_slice %9 {offsets = [0, 136], sizes = [16, 4], strides = [1, 1]} : vector<16x256xf32> to vector<16x4xf32>
    %219 = vector.extract_strided_slice %9 {offsets = [0, 140], sizes = [16, 4], strides = [1, 1]} : vector<16x256xf32> to vector<16x4xf32>
    %220 = vector.extract_strided_slice %9 {offsets = [0, 144], sizes = [16, 4], strides = [1, 1]} : vector<16x256xf32> to vector<16x4xf32>
    %221 = vector.extract_strided_slice %9 {offsets = [0, 148], sizes = [16, 4], strides = [1, 1]} : vector<16x256xf32> to vector<16x4xf32>
    %222 = vector.extract_strided_slice %9 {offsets = [0, 152], sizes = [16, 4], strides = [1, 1]} : vector<16x256xf32> to vector<16x4xf32>
    %223 = vector.extract_strided_slice %9 {offsets = [0, 156], sizes = [16, 4], strides = [1, 1]} : vector<16x256xf32> to vector<16x4xf32>
    %224 = vector.extract_strided_slice %9 {offsets = [0, 160], sizes = [16, 4], strides = [1, 1]} : vector<16x256xf32> to vector<16x4xf32>
    %225 = vector.extract_strided_slice %9 {offsets = [0, 164], sizes = [16, 4], strides = [1, 1]} : vector<16x256xf32> to vector<16x4xf32>
    %226 = vector.extract_strided_slice %9 {offsets = [0, 168], sizes = [16, 4], strides = [1, 1]} : vector<16x256xf32> to vector<16x4xf32>
    %227 = vector.extract_strided_slice %9 {offsets = [0, 172], sizes = [16, 4], strides = [1, 1]} : vector<16x256xf32> to vector<16x4xf32>
    %228 = vector.extract_strided_slice %9 {offsets = [0, 176], sizes = [16, 4], strides = [1, 1]} : vector<16x256xf32> to vector<16x4xf32>
    %229 = vector.extract_strided_slice %9 {offsets = [0, 180], sizes = [16, 4], strides = [1, 1]} : vector<16x256xf32> to vector<16x4xf32>
    %230 = vector.extract_strided_slice %9 {offsets = [0, 184], sizes = [16, 4], strides = [1, 1]} : vector<16x256xf32> to vector<16x4xf32>
    %231 = vector.extract_strided_slice %9 {offsets = [0, 188], sizes = [16, 4], strides = [1, 1]} : vector<16x256xf32> to vector<16x4xf32>
    %232 = arith.maximumf %216, %217 : vector<16x4xf32>
    %233 = arith.maximumf %232, %218 : vector<16x4xf32>
    %234 = arith.maximumf %233, %219 : vector<16x4xf32>
    %235 = arith.maximumf %234, %220 : vector<16x4xf32>
    %236 = arith.maximumf %235, %221 : vector<16x4xf32>
    %237 = arith.maximumf %236, %222 : vector<16x4xf32>
    %238 = arith.maximumf %237, %223 : vector<16x4xf32>
    %239 = arith.maximumf %238, %224 : vector<16x4xf32>
    %240 = arith.maximumf %239, %225 : vector<16x4xf32>
    %241 = arith.maximumf %240, %226 : vector<16x4xf32>
    %242 = arith.maximumf %241, %227 : vector<16x4xf32>
    %243 = arith.maximumf %242, %228 : vector<16x4xf32>
    %244 = arith.maximumf %243, %229 : vector<16x4xf32>
    %245 = arith.maximumf %244, %230 : vector<16x4xf32>
    %246 = arith.maximumf %245, %231 : vector<16x4xf32>
    %247 = arith.subf %216, %246 : vector<16x4xf32>
    %248 = math.exp %247 : vector<16x4xf32>
    %249 = arith.subf %217, %246 : vector<16x4xf32>
    %250 = math.exp %249 : vector<16x4xf32>
    %251 = arith.subf %218, %246 : vector<16x4xf32>
    %252 = math.exp %251 : vector<16x4xf32>
    %253 = arith.subf %219, %246 : vector<16x4xf32>
    %254 = math.exp %253 : vector<16x4xf32>
    %255 = arith.subf %220, %246 : vector<16x4xf32>
    %256 = math.exp %255 : vector<16x4xf32>
    %257 = arith.subf %221, %246 : vector<16x4xf32>
    %258 = math.exp %257 : vector<16x4xf32>
    %259 = arith.subf %222, %246 : vector<16x4xf32>
    %260 = math.exp %259 : vector<16x4xf32>
    %261 = arith.subf %223, %246 : vector<16x4xf32>
    %262 = math.exp %261 : vector<16x4xf32>
    %263 = arith.subf %224, %246 : vector<16x4xf32>
    %264 = math.exp %263 : vector<16x4xf32>
    %265 = arith.subf %225, %246 : vector<16x4xf32>
    %266 = math.exp %265 : vector<16x4xf32>
    %267 = arith.subf %226, %246 : vector<16x4xf32>
    %268 = math.exp %267 : vector<16x4xf32>
    %269 = arith.subf %227, %246 : vector<16x4xf32>
    %270 = math.exp %269 : vector<16x4xf32>
    %271 = arith.subf %228, %246 : vector<16x4xf32>
    %272 = math.exp %271 : vector<16x4xf32>
    %273 = arith.subf %229, %246 : vector<16x4xf32>
    %274 = math.exp %273 : vector<16x4xf32>
    %275 = arith.subf %230, %246 : vector<16x4xf32>
    %276 = math.exp %275 : vector<16x4xf32>
    %277 = arith.subf %231, %246 : vector<16x4xf32>
    %278 = math.exp %277 : vector<16x4xf32>
    %279 = arith.addf %248, %250 : vector<16x4xf32>
    %280 = arith.addf %279, %252 : vector<16x4xf32>
    %281 = arith.addf %280, %254 : vector<16x4xf32>
    %282 = arith.addf %281, %256 : vector<16x4xf32>
    %283 = arith.addf %282, %258 : vector<16x4xf32>
    %284 = arith.addf %283, %260 : vector<16x4xf32>
    %285 = arith.addf %284, %262 : vector<16x4xf32>
    %286 = arith.addf %285, %264 : vector<16x4xf32>
    %287 = arith.addf %286, %266 : vector<16x4xf32>
    %288 = arith.addf %287, %268 : vector<16x4xf32>
    %289 = arith.addf %288, %270 : vector<16x4xf32>
    %290 = arith.addf %289, %272 : vector<16x4xf32>
    %291 = arith.addf %290, %274 : vector<16x4xf32>
    %292 = arith.addf %291, %276 : vector<16x4xf32>
    %293 = arith.addf %292, %278 : vector<16x4xf32>
    %294 = tpu.reciprocal %293 {approx = true} : vector<16x4xf32> -> vector<16x4xf32>
    %295 = arith.mulf %248, %294 : vector<16x4xf32>
    %296 = arith.mulf %250, %294 : vector<16x4xf32>
    %297 = arith.mulf %252, %294 : vector<16x4xf32>
    %298 = arith.mulf %254, %294 : vector<16x4xf32>
    %299 = arith.mulf %256, %294 : vector<16x4xf32>
    %300 = arith.mulf %258, %294 : vector<16x4xf32>
    %301 = arith.mulf %260, %294 : vector<16x4xf32>
    %302 = arith.mulf %262, %294 : vector<16x4xf32>
    %303 = arith.mulf %264, %294 : vector<16x4xf32>
    %304 = arith.mulf %266, %294 : vector<16x4xf32>
    %305 = arith.mulf %268, %294 : vector<16x4xf32>
    %306 = arith.mulf %270, %294 : vector<16x4xf32>
    %307 = arith.mulf %272, %294 : vector<16x4xf32>
    %308 = arith.mulf %274, %294 : vector<16x4xf32>
    %309 = arith.mulf %276, %294 : vector<16x4xf32>
    %310 = arith.mulf %278, %294 : vector<16x4xf32>
    %311 = arith.addf %200, %295 : vector<16x4xf32>
    %312 = arith.addf %201, %296 : vector<16x4xf32>
    %313 = arith.addf %202, %297 : vector<16x4xf32>
    %314 = arith.addf %203, %298 : vector<16x4xf32>
    %315 = arith.addf %204, %299 : vector<16x4xf32>
    %316 = arith.addf %205, %300 : vector<16x4xf32>
    %317 = arith.addf %206, %301 : vector<16x4xf32>
    %318 = arith.addf %207, %302 : vector<16x4xf32>
    %319 = arith.addf %208, %303 : vector<16x4xf32>
    %320 = arith.addf %209, %304 : vector<16x4xf32>
    %321 = arith.addf %210, %305 : vector<16x4xf32>
    %322 = arith.addf %211, %306 : vector<16x4xf32>
    %323 = arith.addf %212, %307 : vector<16x4xf32>
    %324 = arith.addf %213, %308 : vector<16x4xf32>
    %325 = arith.addf %214, %309 : vector<16x4xf32>
    %326 = arith.addf %215, %310 : vector<16x4xf32>
    %327 = vector.extract_strided_slice %9 {offsets = [0, 192], sizes = [16, 4], strides = [1, 1]} : vector<16x256xf32> to vector<16x4xf32>
    %328 = vector.extract_strided_slice %9 {offsets = [0, 196], sizes = [16, 4], strides = [1, 1]} : vector<16x256xf32> to vector<16x4xf32>
    %329 = vector.extract_strided_slice %9 {offsets = [0, 200], sizes = [16, 4], strides = [1, 1]} : vector<16x256xf32> to vector<16x4xf32>
    %330 = vector.extract_strided_slice %9 {offsets = [0, 204], sizes = [16, 4], strides = [1, 1]} : vector<16x256xf32> to vector<16x4xf32>
    %331 = vector.extract_strided_slice %9 {offsets = [0, 208], sizes = [16, 4], strides = [1, 1]} : vector<16x256xf32> to vector<16x4xf32>
    %332 = vector.extract_strided_slice %9 {offsets = [0, 212], sizes = [16, 4], strides = [1, 1]} : vector<16x256xf32> to vector<16x4xf32>
    %333 = vector.extract_strided_slice %9 {offsets = [0, 216], sizes = [16, 4], strides = [1, 1]} : vector<16x256xf32> to vector<16x4xf32>
    %334 = vector.extract_strided_slice %9 {offsets = [0, 220], sizes = [16, 4], strides = [1, 1]} : vector<16x256xf32> to vector<16x4xf32>
    %335 = vector.extract_strided_slice %9 {offsets = [0, 224], sizes = [16, 4], strides = [1, 1]} : vector<16x256xf32> to vector<16x4xf32>
    %336 = vector.extract_strided_slice %9 {offsets = [0, 228], sizes = [16, 4], strides = [1, 1]} : vector<16x256xf32> to vector<16x4xf32>
    %337 = vector.extract_strided_slice %9 {offsets = [0, 232], sizes = [16, 4], strides = [1, 1]} : vector<16x256xf32> to vector<16x4xf32>
    %338 = vector.extract_strided_slice %9 {offsets = [0, 236], sizes = [16, 4], strides = [1, 1]} : vector<16x256xf32> to vector<16x4xf32>
    %339 = vector.extract_strided_slice %9 {offsets = [0, 240], sizes = [16, 4], strides = [1, 1]} : vector<16x256xf32> to vector<16x4xf32>
    %340 = vector.extract_strided_slice %9 {offsets = [0, 244], sizes = [16, 4], strides = [1, 1]} : vector<16x256xf32> to vector<16x4xf32>
    %341 = vector.extract_strided_slice %9 {offsets = [0, 248], sizes = [16, 4], strides = [1, 1]} : vector<16x256xf32> to vector<16x4xf32>
    %342 = vector.extract_strided_slice %9 {offsets = [0, 252], sizes = [16, 4], strides = [1, 1]} : vector<16x256xf32> to vector<16x4xf32>
    %343 = arith.maximumf %327, %328 : vector<16x4xf32>
    %344 = arith.maximumf %343, %329 : vector<16x4xf32>
    %345 = arith.maximumf %344, %330 : vector<16x4xf32>
    %346 = arith.maximumf %345, %331 : vector<16x4xf32>
    %347 = arith.maximumf %346, %332 : vector<16x4xf32>
    %348 = arith.maximumf %347, %333 : vector<16x4xf32>
    %349 = arith.maximumf %348, %334 : vector<16x4xf32>
    %350 = arith.maximumf %349, %335 : vector<16x4xf32>
    %351 = arith.maximumf %350, %336 : vector<16x4xf32>
    %352 = arith.maximumf %351, %337 : vector<16x4xf32>
    %353 = arith.maximumf %352, %338 : vector<16x4xf32>
    %354 = arith.maximumf %353, %339 : vector<16x4xf32>
    %355 = arith.maximumf %354, %340 : vector<16x4xf32>
    %356 = arith.maximumf %355, %341 : vector<16x4xf32>
    %357 = arith.maximumf %356, %342 : vector<16x4xf32>
    %358 = arith.subf %327, %357 : vector<16x4xf32>
    %359 = math.exp %358 : vector<16x4xf32>
    %360 = arith.subf %328, %357 : vector<16x4xf32>
    %361 = math.exp %360 : vector<16x4xf32>
    %362 = arith.subf %329, %357 : vector<16x4xf32>
    %363 = math.exp %362 : vector<16x4xf32>
    %364 = arith.subf %330, %357 : vector<16x4xf32>
    %365 = math.exp %364 : vector<16x4xf32>
    %366 = arith.subf %331, %357 : vector<16x4xf32>
    %367 = math.exp %366 : vector<16x4xf32>
    %368 = arith.subf %332, %357 : vector<16x4xf32>
    %369 = math.exp %368 : vector<16x4xf32>
    %370 = arith.subf %333, %357 : vector<16x4xf32>
    %371 = math.exp %370 : vector<16x4xf32>
    %372 = arith.subf %334, %357 : vector<16x4xf32>
    %373 = math.exp %372 : vector<16x4xf32>
    %374 = arith.subf %335, %357 : vector<16x4xf32>
    %375 = math.exp %374 : vector<16x4xf32>
    %376 = arith.subf %336, %357 : vector<16x4xf32>
    %377 = math.exp %376 : vector<16x4xf32>
    %378 = arith.subf %337, %357 : vector<16x4xf32>
    %379 = math.exp %378 : vector<16x4xf32>
    %380 = arith.subf %338, %357 : vector<16x4xf32>
    %381 = math.exp %380 : vector<16x4xf32>
    %382 = arith.subf %339, %357 : vector<16x4xf32>
    %383 = math.exp %382 : vector<16x4xf32>
    %384 = arith.subf %340, %357 : vector<16x4xf32>
    %385 = math.exp %384 : vector<16x4xf32>
    %386 = arith.subf %341, %357 : vector<16x4xf32>
    %387 = math.exp %386 : vector<16x4xf32>
    %388 = arith.subf %342, %357 : vector<16x4xf32>
    %389 = math.exp %388 : vector<16x4xf32>
    %390 = arith.addf %359, %361 : vector<16x4xf32>
    %391 = arith.addf %390, %363 : vector<16x4xf32>
    %392 = arith.addf %391, %365 : vector<16x4xf32>
    %393 = arith.addf %392, %367 : vector<16x4xf32>
    %394 = arith.addf %393, %369 : vector<16x4xf32>
    %395 = arith.addf %394, %371 : vector<16x4xf32>
    %396 = arith.addf %395, %373 : vector<16x4xf32>
    %397 = arith.addf %396, %375 : vector<16x4xf32>
    %398 = arith.addf %397, %377 : vector<16x4xf32>
    %399 = arith.addf %398, %379 : vector<16x4xf32>
    %400 = arith.addf %399, %381 : vector<16x4xf32>
    %401 = arith.addf %400, %383 : vector<16x4xf32>
    %402 = arith.addf %401, %385 : vector<16x4xf32>
    %403 = arith.addf %402, %387 : vector<16x4xf32>
    %404 = arith.addf %403, %389 : vector<16x4xf32>
    %405 = tpu.reciprocal %404 {approx = true} : vector<16x4xf32> -> vector<16x4xf32>
    %406 = arith.mulf %359, %405 : vector<16x4xf32>
    %407 = arith.mulf %361, %405 : vector<16x4xf32>
    %408 = arith.mulf %363, %405 : vector<16x4xf32>
    %409 = arith.mulf %365, %405 : vector<16x4xf32>
    %410 = arith.mulf %367, %405 : vector<16x4xf32>
    %411 = arith.mulf %369, %405 : vector<16x4xf32>
    %412 = arith.mulf %371, %405 : vector<16x4xf32>
    %413 = arith.mulf %373, %405 : vector<16x4xf32>
    %414 = arith.mulf %375, %405 : vector<16x4xf32>
    %415 = arith.mulf %377, %405 : vector<16x4xf32>
    %416 = arith.mulf %379, %405 : vector<16x4xf32>
    %417 = arith.mulf %381, %405 : vector<16x4xf32>
    %418 = arith.mulf %383, %405 : vector<16x4xf32>
    %419 = arith.mulf %385, %405 : vector<16x4xf32>
    %420 = arith.mulf %387, %405 : vector<16x4xf32>
    %421 = arith.mulf %389, %405 : vector<16x4xf32>
    %422 = arith.addf %311, %406 : vector<16x4xf32>
    %423 = arith.addf %312, %407 : vector<16x4xf32>
    %424 = arith.addf %313, %408 : vector<16x4xf32>
    %425 = arith.addf %314, %409 : vector<16x4xf32>
    %426 = arith.addf %315, %410 : vector<16x4xf32>
    %427 = arith.addf %316, %411 : vector<16x4xf32>
    %428 = arith.addf %317, %412 : vector<16x4xf32>
    %429 = arith.addf %318, %413 : vector<16x4xf32>
    %430 = arith.addf %319, %414 : vector<16x4xf32>
    %431 = arith.addf %320, %415 : vector<16x4xf32>
    %432 = arith.addf %321, %416 : vector<16x4xf32>
    %433 = arith.addf %322, %417 : vector<16x4xf32>
    %434 = arith.addf %323, %418 : vector<16x4xf32>
    %435 = arith.addf %324, %419 : vector<16x4xf32>
    %436 = arith.addf %325, %420 : vector<16x4xf32>
    %437 = arith.addf %326, %421 : vector<16x4xf32>
    %438 = tpu.concatenate %422, %423, %424, %425, %426, %427, %428, %429, %430, %431, %432, %433, %434, %435, %436, %437 in 1 : vector<16x4xf32>, vector<16x4xf32>, vector<16x4xf32>, vector<16x4xf32>, vector<16x4xf32>, vector<16x4xf32>, vector<16x4xf32>, vector<16x4xf32>, vector<16x4xf32>, vector<16x4xf32>, vector<16x4xf32>, vector<16x4xf32>, vector<16x4xf32>, vector<16x4xf32>, vector<16x4xf32>, vector<16x4xf32> -> vector<16x64xf32>
    %cst_8 = arith.constant 2.500000e-01 : f32
    %439 = vector.broadcast %cst_8 : f32 to vector<16x64xf32>
    %440 = arith.mulf %438, %439 : vector<16x64xf32>
    %441 = tpu.concatenate %440, %440 in 1 : vector<16x64xf32>, vector<16x64xf32> -> vector<16x128xf32>
    %c0_9 = arith.constant 0 : index
    %c0_10 = arith.constant 0 : index
    %442 = vector.load %arg5[%c0_9, %c0_10] : memref<16x128xbf16, #tpu.memory_space<vmem>>, vector<16x128xbf16>
    %443 = arith.extf %442 : vector<16x128xbf16> to vector<16x128xf32>
    %444 = arith.mulf %441, %443 : vector<16x128xf32>
    %c0_11 = arith.constant 0 : index
    %c0_12 = arith.constant 0 : index
    %445 = vector.load %arg6[%c0_11, %c0_12] : memref<4x8xbf16, #tpu.memory_space<vmem>>, vector<4x8xbf16>
    %cst_13 = arith.constant dense<0.000000e+00> : vector<16x8xf32>
    %446 = tpu.matmul %1, %445, %cst_13 {dimension_numbers = #tpu.dot_dimension_numbers<[1], [0], [0], [1], [0, 0, 1, 1], [], []>} : vector<16x4xbf16>, vector<4x8xbf16>, vector<16x8xf32> -> vector<16x8xf32>
    %447 = arith.truncf %444 : vector<16x128xf32> to vector<16x128xbf16>
    %c0_14 = arith.constant 0 : index
    %c0_15 = arith.constant 0 : index
    %448 = vector.load %arg7[%c0_14, %c0_15] : memref<128x8xbf16, #tpu.memory_space<vmem>>, vector<128x8xbf16>
    %cst_16 = arith.constant dense<0.000000e+00> : vector<16x8xf32>
    %449 = tpu.matmul %447, %448, %cst_16 {dimension_numbers = #tpu.dot_dimension_numbers<[1], [0], [0], [1], [0, 0, 1, 1], [], []>} : vector<16x128xbf16>, vector<128x8xbf16>, vector<16x8xf32> -> vector<16x8xf32>
    %450 = arith.addf %446, %449 : vector<16x8xf32>
    %c0_17 = arith.constant 0 : index
    %c0_18 = arith.constant 0 : index
    %451 = vector.load %arg8[%c0_17, %c0_18] : memref<1x8xf32, #tpu.memory_space<vmem>>, vector<1x8xf32>
    %452 = vector.broadcast %451 : vector<1x8xf32> to vector<16x8xf32>
    %453 = arith.addf %450, %452 : vector<16x8xf32>
    %454 = vector.extract_strided_slice %453 {offsets = [0, 0], sizes = [16, 4], strides = [1, 1]} : vector<16x8xf32> to vector<16x4xf32>
    %455 = arith.negf %454 : vector<16x4xf32>
    %456 = math.exp %455 : vector<16x4xf32>
    %cst_19 = arith.constant 1.000000e+00 : f32
    %457 = vector.broadcast %cst_19 : f32 to vector<16x4xf32>
    %458 = arith.addf %457, %456 : vector<16x4xf32>
    %459 = arith.divf %457, %458 : vector<16x4xf32>
    %460 = vector.extract_strided_slice %453 {offsets = [0, 4], sizes = [16, 4], strides = [1, 1]} : vector<16x8xf32> to vector<16x4xf32>
    %461 = arith.negf %460 : vector<16x4xf32>
    %462 = math.exp %461 : vector<16x4xf32>
    %cst_20 = arith.constant 1.000000e+00 : f32
    %463 = vector.broadcast %cst_20 : f32 to vector<16x4xf32>
    %464 = arith.addf %463, %462 : vector<16x4xf32>
    %465 = arith.divf %463, %464 : vector<16x4xf32>
    %466 = arith.mulf %460, %465 : vector<16x4xf32>
    %467 = arith.mulf %459, %466 : vector<16x4xf32>
    %468 = arith.addf %0, %467 : vector<16x4xf32>
    %c0_21 = arith.constant 0 : index
    %c0_22 = arith.constant 0 : index
    %469 = vector.load %arg9[%c0_21, %c0_22] : memref<16x4xf32, #tpu.memory_space<vmem>>, vector<16x4xf32>
    tpu.vector_store %arg9[%c0_21, %c0_22], %468 {strides = array<i32>} : memref<16x4xf32, #tpu.memory_space<vmem>>, vector<16x4xf32>,
    return
  }
  func.func @transform_0(%arg0: i32) -> (i32, i32) {
    %c0_i32 = arith.constant 0 : i32
    %c0_i32_0 = arith.constant 0 : i32
    return %arg0, %c0_i32 : i32, i32
  }
  func.func @transform_1(%arg0: i32) -> (i32, i32) {
    %c0_i32 = arith.constant 0 : i32
    %c0_i32_0 = arith.constant 0 : i32
    %c0_i32_1 = arith.constant 0 : i32
    return %c0_i32, %c0_i32_0 : i32, i32
  }
  func.func @transform_2(%arg0: i32) -> (i32, i32) {
    %c0_i32 = arith.constant 0 : i32
    %c0_i32_0 = arith.constant 0 : i32
    %c0_i32_1 = arith.constant 0 : i32
    return %c0_i32, %c0_i32_0 : i32, i32
  }
  func.func @transform_3(%arg0: i32) -> (i32, i32) {
    %c0_i32 = arith.constant 0 : i32
    %c0_i32_0 = arith.constant 0 : i32
    %c0_i32_1 = arith.constant 0 : i32
    return %c0_i32, %c0_i32_0 : i32, i32
  }
  func.func @transform_4(%arg0: i32) -> (i32, i32) {
    %c0_i32 = arith.constant 0 : i32
    %c0_i32_0 = arith.constant 0 : i32
    %c0_i32_1 = arith.constant 0 : i32
    return %c0_i32, %c0_i32_0 : i32, i32
  }
  func.func @transform_5(%arg0: i32) -> (i32, i32) {
    %c0_i32 = arith.constant 0 : i32
    %c0_i32_0 = arith.constant 0 : i32
    %c0_i32_1 = arith.constant 0 : i32
    return %c0_i32, %c0_i32_0 : i32, i32
  }
  func.func @transform_6(%arg0: i32) -> (i32, i32) {
    %c0_i32 = arith.constant 0 : i32
    %c0_i32_0 = arith.constant 0 : i32
    %c0_i32_1 = arith.constant 0 : i32
    return %c0_i32, %c0_i32_0 : i32, i32
  }
  func.func @transform_7(%arg0: i32) -> (i32, i32) {
    %c0_i32 = arith.constant 0 : i32
    %c0_i32_0 = arith.constant 0 : i32
    %c0_i32_1 = arith.constant 0 : i32
    return %c0_i32, %c0_i32_0 : i32, i32
  }
  func.func @transform_8(%arg0: i32) -> (i32, i32) {
    %c0_i32 = arith.constant 0 : i32
    %c0_i32_0 = arith.constant 0 : i32
    return %arg0, %c0_i32 : i32, i32
  }
}

</mosaic_0001>

<bundles_post_ra>
// kernel: tpu_custom_call.1
= control target key start
LH: loop header
LB: loop body
LE: loop exit
PB: predicated region body
PF: predicated region fallthrough
CT: control target
= control target key end

     0   :  { %s2640_s27 = smov 0   ;;  %s4013_s0 = inlined_call_operand.vmem [shape: f32[32,4], index: 0, kind: input, shape index: {}]   ;;  %s4014_s1 = inlined_call_operand.vmem [shape: bf16[4,32], index: 1, kind: input, shape index: {}]   ;;  %s4015_s2 = inlined_call_operand.vmem [shape: f32[1,32], index: 2, kind: input, shape index: {}]   ;;  %s4016_s3 = inlined_call_operand.vmem [shape: bf16[32,256], index: 3, kind: input, shape index: {}]   ;;  %s4017_s4 = inlined_call_operand.vmem [shape: bf16[16,128], index: 4, kind: input, shape index: {}]   ;;  %s4018_s5 = inlined_call_operand.vmem [shape: bf16[4,8], index: 5, kind: input, shape index: {}]   ;;  %s4019_s6 = inlined_call_operand.vmem [shape: bf16[128,8], index: 6, kind: input, shape index: {}]   ;;  %s4020_s7 = inlined_call_operand.vmem [shape: f32[1,8], index: 7, kind: input, shape index: {}]   ;;  %s4021_s8 = inlined_call_operand.vmem [shape: f32[32,4], index: 8, kind: output, shape index: {}]  }
   0x1 LB: > { %s2272_s28 = sadd.s32 4294967295, %s2559_s27   ;;  %p2276_p0 = scmp.ge.s32.totalorder %s2559_s27, 1  ;;  %s2559_s27 = sphi %s2640_s27, %s18_s27  }
   0x2   : > { %p263_p1 = scmp.lt.s32.totalorder %s2559_s27, 3 }
   0x4   : > { %p264_p2 = pnand %p2276_p0, %p263_p1 }
   0x6   : > { %267 = sbr.rel (%p264_p2) target bundleno = 1852 (0x73c), region = 52 }
   0xd   : > { %v313_v0 = vld [vmem:[%s4014_s1] sm:$0x3]  ;;  %vm325_vm0 = vcmask 1041408   ;;  %v4067_v1 = vmov 0.0   ;;  %s2277_s9 = sshll.u32 %s2272_s28, 1  ;;  %vm2562_vm1 = vmmov 0  }
   0xe   : > { %2319 = vmatprep.subr.bf16.mxu1 %v4067_v1  ;;  %v327_v2 = vsel %vm325_vm0, %v313_v0, 0  ;;  %2325 = vmatprep.subr.bf16.mxu0 %v4067_v1  ;;  %p298_p3 = scmp.lt.s32.totalorder %s2277_s9, 3  ;;  %v2395_v3 = vld [vmem:[%s4016_s3 + $0x4] ss:$8 sps:$4 sm:$0xff]   ;;  %v2393_v4 = vld [vmem:[%s4016_s3] ss:$8 sps:$4 sm:$0xff]  }
   0xf   : > { %2320 = vmatpush3.bf16.msra.mxu1 %v327_v2  ;;  %2321 = vmatprep.mubr.msk.bf16.mxu1 %vm2562_vm1, %v4067_v1  ;;  %vm321_vm2 = vcmask 31744   ;;  %v2398_v8 = vld [vmem:[%s4016_s3 + $0x14] ss:$8 sps:$4 sm:$0xff]   ;;  %v2396_v9 = vld [vmem:[%s4016_s3 + $0x10] ss:$8 sps:$4 sm:$0xff]   ;;  %v2563_v10 = vmov 0  }
  0x10   : > { %2341 = vmatprep.mubr.msk.bf16.mxu0 %vm2562_vm1, %v4067_v1  ;;  %s4193_s9 = smov (!%p298_p3, %s2277_s9), 3  ;;  %399 = vmatprep.subr.bf16.mxu1 %v2395_v3  ;;  %v2281_v11 = vld [vmem:[%s4015_s2] ss:$0 sm:$0xff]  ;;  %vm395_vm3 = vcmask 261120   ;;  %s2564_s26 = smov 120   ;;  %vm1968_vm4 = vcmask 64512  }
  0x11   : > { %s4022_s12 = sshll.u32 %s4193_s9, 3  ;;  %v2028_v14 = vld [vmem:[%s4018_s5] sm:$0x3]  ;;  %s2565_s28 = smov 124   ;;  %vm1971_vm5 = vcmask 97280   ;;  %vm1974_vm6 = vcmask 130048  }
  0x12   : > { %s2672_s17 = scalar_lea.vmem %s4013_s0, %s4022_s12  ;;  %v2136_v19 = vsel %vm325_vm0, %v2028_v14, 0  ;;  %s2566_s29 = smov 116   ;;  %vm1977_vm7 = vcmask 162816   ;;  %vm1980_vm8 = vcmask 195584   ;;  %vm1983_vm9 = vcmask 228352  }
  0x13   : > { %v310_v5 = vld [vmem:[%s2672_s17] sm:$0xff]  ;;  %v311_v6 = vld [vmem:[%s2672_s17 + $0x8] sm:$0xff]  ;;  %s2567_s30 = smov 112   ;;  %s4043_s10 = smov 108   ;;  %vm1988_vm10 = vcmask 293888   ;;  %vm1991_vm11 = vcmask 326656  }
  0x14   : > { %v312_v7 = vpack.c.bf16 %v311_v6, %v310_v5  ;;  %s4041_s11 = smov 104   ;;  %s4039_s13 = smov 100   ;;  %vm1994_vm12 = vcmask 359424   ;;  %vm1997_vm13 = vcmask 392192   ;;  %vm2000_vm14 = vcmask 424960  }
  0x15   : > { %s4037_s14 = smov 96   ;;  %s4035_s15 = smov 92   ;;  %vm2003_vm15 = vcmask 457728   ;;  %vm2006_vm0 = vcmask 490496  }
  0x16   : > { %2322 = vmatmul.mubr.msk.bf16.vlgmr.msra.gmra.mrb[0].mxu1 %vm321_vm2, %v312_v7  ;;  %s4033_s16 = smov 88   ;;  %s4031_s18 = smov 84  }
  0x17   : > { %400 = vmatpush1.bf16.msra.mxu1 %v2393_v4  ;;  %431 = vmatprep.mubr.bf16.mxu1 %v2563_v10  ;;  %s4029_s19 = smov 80   ;;  %s4027_s20 = smov 76  }
  0x18   : > { %401 = vmatprep.subr.bf16.mxu1 %v2398_v8  ;;  %s4025_s21 = smov 72   ;;  %s4023_s22 = smov 68  }
  0x19   : > { %s2579_s23 = smov 4   ;;  %s2580_s24 = smov 8  }
  0x1a   : > { %s2581_s25 = smov 12   ;;  %s4045_s12 = smov 16  }
  0x1b   : > { %402 = vmatpush1.bf16.msra.mxu1 %v2396_v9 }
  0x1c   : > { %2345 = vmatprep.subr.bf16.mxu1 %v4067_v1 }
  0xe9   : > { %v363_v12 = vpop.f32.mrb[0].mxu1 }
  0xea   : > { %v2323_v13 = vpop.f32.mrb[1].mxu1  ;;  %v364_v16 = vadd.f32 %v2281_v11, %v363_v12 }
  0xeb   : > { %v366_v15 = vpop.f32.mrb[2].mxu1 }
  0xec   : > { %v367_v17 = vadd.f32 %v2281_v11, %v366_v15  ;;  %v2324_v18 = vpop.f32.mrb[3].mxu1 }
  0xee   : > { %v370_v20 = vpack.c.bf16 %v367_v17, %v364_v16 }
  0xf0   : > { %2287 = vmatmul.mubr.msk.bf16.vlgmr.msra.gmra.mrb[4].mxu1 %vm395_vm3, %v370_v20 }
  0xf1   : > { %2346 = vmatpush3.bf16.msra.mxu1 %v2136_v19  ;;  %2347 = vmatprep.mubr.msk.bf16.mxu1 %vm2562_vm1, %v4067_v1  ;;  %vm2019_vm1 = vcmask 523264  }
  0xf8   : > { %2348 = vmatmul.mubr.msk.bf16.vlgmr.msra.gmra.mrb[8].mxu1 %vm321_vm2, %v312_v7 }
 0x1c3   : > { %v2695_v21 = vpop.f32.mrb[4].mxu1 }
 0x1c4   : > { %452 = vrot.lane.b32.xlu1 %v2695_v21, %s2564_s26  ;;  %444 = vrot.lane.b32.xlu0 %v2695_v21, %s2565_s28  ;;  %v2701_v22 = vpop.f32.mrb[5].mxu1 }
 0x1c5   : > { %v2703_v23 = vpop.f32.mrb[6].mxu1 }
 0x1c6   : > { %v2705_v24 = vpop.f32.mrb[7].mxu1 }
 0x1c8   : > { %460 = vrot.lane.b32.xlu0 %v2695_v21, %s2566_s29  ;;  %454 = vrot.lane.b32.xlu1 %v2703_v23, %s2564_s26 }
 0x1cc   : > { %468 = vrot.lane.b32.xlu0 %v2695_v21, %s2567_s30  ;;  %462 = vrot.lane.b32.xlu1 %v2703_v23, %s2566_s29 }
 0x1d0   : > { %476 = vrot.lane.b32.xlu0 %v2695_v21, %s4043_s10  ;;  %470 = vrot.lane.b32.xlu1 %v2703_v23, %s2567_s30 }
 0x1d4   : > { %484 = vrot.lane.b32.xlu0 %v2695_v21, %s4041_s11  ;;  %478 = vrot.lane.b32.xlu1 %v2703_v23, %s4043_s10 }
 0x1d8   : > { %492 = vrot.lane.b32.xlu0 %v2695_v21, %s4039_s13  ;;  %486 = vrot.lane.b32.xlu1 %v2703_v23, %s4041_s11 }
 0x1dc   : > { %500 = vrot.lane.b32.xlu0 %v2695_v21, %s4037_s14  ;;  %494 = vrot.lane.b32.xlu1 %v2703_v23, %s4039_s13 }
 0x1e0   : > { %508 = vrot.lane.b32.xlu0 %v2695_v21, %s4035_s15  ;;  %502 = vrot.lane.b32.xlu1 %v2703_v23, %s4037_s14 }
 0x1e4   : > { %516 = vrot.lane.b32.xlu0 %v2695_v21, %s4033_s16  ;;  %510 = vrot.lane.b32.xlu1 %v2703_v23, %s4035_s15 }
 0x1e8   : > { %524 = vrot.lane.b32.xlu0 %v2695_v21, %s4031_s18  ;;  %518 = vrot.lane.b32.xlu1 %v2703_v23, %s4033_s16 }
 0x1ec   : > { %532 = vrot.lane.b32.xlu0 %v2695_v21, %s4029_s19  ;;  %526 = vrot.lane.b32.xlu1 %v2703_v23, %s4031_s18 }
 0x1f0   : > { %540 = vrot.lane.b32.xlu0 %v2695_v21, %s4027_s20  ;;  %534 = vrot.lane.b32.xlu1 %v2703_v23, %s4029_s19 }
 0x1f4   : > { %548 = vrot.lane.b32.xlu0 %v2695_v21, %s4025_s21  ;;  %542 = vrot.lane.b32.xlu1 %v2703_v23, %s4027_s20 }
 0x1f8   : > { %556 = vrot.lane.b32.xlu0 %v2695_v21, %s4023_s22  ;;  %550 = vrot.lane.b32.xlu1 %v2703_v23, %s4025_s21 }
 0x1fc   : > { %1190 = vrot.lane.b32.xlu0 %v2701_v22, %s2565_s28  ;;  %558 = vrot.lane.b32.xlu1 %v2703_v23, %s4023_s22 }
 0x200   : > { %1198 = vrot.lane.b32.xlu0 %v2701_v22, %s2564_s26  ;;  %1192 = vrot.lane.b32.xlu1 %v2705_v24, %s2565_s28 }
 0x204   : > { %1206 = vrot.lane.b32.xlu0 %v2701_v22, %s2566_s29  ;;  %1200 = vrot.lane.b32.xlu1 %v2705_v24, %s2564_s26 }
 0x208   : > { %1214 = vrot.lane.b32.xlu0 %v2701_v22, %s2567_s30  ;;  %1208 = vrot.lane.b32.xlu1 %v2705_v24, %s2566_s29 }
 0x20c   : > { %1222 = vrot.lane.b32.xlu0 %v2701_v22, %s4043_s10  ;;  %1216 = vrot.lane.b32.xlu1 %v2705_v24, %s2567_s30 }
 0x210   : > { %1230 = vrot.lane.b32.xlu0 %v2701_v22, %s4041_s11  ;;  %1224 = vrot.lane.b32.xlu1 %v2705_v24, %s4043_s10  ;;  %s2593_s10 = smov 60  }
 0x214   : > { %1238 = vrot.lane.b32.xlu0 %v2701_v22, %s4039_s13  ;;  %1232 = vrot.lane.b32.xlu1 %v2705_v24, %s4041_s11  ;;  %s4065_s11 = smov 56  }
 0x218   : > { %1246 = vrot.lane.b32.xlu0 %v2701_v22, %s4037_s14  ;;  %1240 = vrot.lane.b32.xlu1 %v2705_v24, %s4039_s13  ;;  %s4063_s13 = smov 52  }
 0x21c   : > { %1254 = vrot.lane.b32.xlu0 %v2701_v22, %s4035_s15  ;;  %1248 = vrot.lane.b32.xlu1 %v2705_v24, %s4037_s14  ;;  %s4061_s14 = smov 48  }
 0x220   : > { %1262 = vrot.lane.b32.xlu0 %v2701_v22, %s4033_s16  ;;  %1256 = vrot.lane.b32.xlu1 %v2705_v24, %s4035_s15  ;;  %s4059_s15 = smov 44  }
 0x224   : > { %1270 = vrot.lane.b32.xlu0 %v2701_v22, %s4031_s18  ;;  %1264 = vrot.lane.b32.xlu1 %v2705_v24, %s4033_s16  ;;  %s4057_s16 = smov 40  }
 0x228   : > { %1278 = vrot.lane.b32.xlu0 %v2701_v22, %s4029_s19  ;;  %1272 = vrot.lane.b32.xlu1 %v2705_v24, %s4031_s18  ;;  %s4055_s18 = smov 36  }
 0x22c   : > { %1286 = vrot.lane.b32.xlu0 %v2701_v22, %s4027_s20  ;;  %1280 = vrot.lane.b32.xlu1 %v2705_v24, %s4029_s19  ;;  %s4053_s19 = smov 32  }
 0x230   : > { %1294 = vrot.lane.b32.xlu0 %v2701_v22, %s4025_s21  ;;  %1288 = vrot.lane.b32.xlu1 %v2705_v24, %s4027_s20  ;;  %s4051_s20 = smov 28  }
 0x234   : > { %1302 = vrot.lane.b32.xlu0 %v2701_v22, %s4023_s22  ;;  %1296 = vrot.lane.b32.xlu1 %v2705_v24, %s4025_s21  ;;  %s4049_s21 = smov 24  }
 0x236   : > { %v445_v25 = vpop.permute.xlu0 %444  ;;  %v453_v26 = vpop.permute.xlu1 %452 }
 0x237   : > { %v450_v35 = vmax.f32 %v2695_v21, %v445_v25 }
 0x238   : > { %446 = vrot.lane.b32.xlu0 %v2703_v23, %s2565_s28  ;;  %1304 = vrot.lane.b32.xlu1 %v2705_v24, %s4023_s22  ;;  %s4047_s22 = smov 20  }
 0x239   : > { %v458_v37 = vmax.f32 %v450_v35, %v453_v26 }
 0x23a   : > { %v461_v27 = vpop.permute.xlu0 %460  ;;  %v2823_v28 = vpop.permute.xlu1 %454 }
 0x23b   : > { %v466_v40 = vmax.f32 %v458_v37, %v461_v27 }
 0x23e   : > { %v469_v29 = vpop.permute.xlu0 %468  ;;  %v2825_v31 = vpop.permute.xlu1 %462 }
 0x23f   : > { %v474_v41 = vmax.f32 %v466_v40, %v469_v29  ;;  %v459_v26 = vmax.f32 %v2825_v31, %v2823_v28 }
 0x242   : > { %v477_v30 = vpop.permute.xlu0 %476  ;;  %v2827_v33 = vpop.permute.xlu1 %470 }
 0x243   : > { %v482_v44 = vmax.f32 %v474_v41, %v477_v30  ;;  %v467_v29 = vmax.f32 %v459_v26, %v2827_v33 }
 0x246   : > { %v485_v32 = vpop.permute.xlu0 %484  ;;  %v2830_v38 = vpop.permute.xlu1 %478 }
 0x247   : > { %v490_v45 = vmax.f32 %v482_v44, %v485_v32 }
 0x24a   : > { %v493_v34 = vpop.permute.xlu0 %492  ;;  %v2832_v42 = vpop.permute.xlu1 %486 }
 0x24b   : > { %v498_v47 = vmax.f32 %v490_v45, %v493_v34  ;;  %v475_v34 = vmax.f32 %v467_v29, %v2830_v38 }
 0x24d   : > { %v483_v37 = vmax.f32 %v475_v34, %v2832_v42 }
 0x24e   : > { %v501_v36 = vpop.permute.xlu0 %500  ;;  %v2834_v48 = vpop.permute.xlu1 %494 }
 0x24f   : > { %v506_v49 = vmax.f32 %v498_v47, %v501_v36  ;;  %v491_v31 = vmax.f32 %v483_v37, %v2834_v48 }
 0x252   : > { %v509_v39 = vpop.permute.xlu0 %508  ;;  %v2836_v53 = vpop.permute.xlu1 %502 }
 0x253   : > { %v514_v51 = vmax.f32 %v506_v49, %v509_v39  ;;  %v499_v40 = vmax.f32 %v491_v31, %v2836_v53 }
 0x256   : > { %v517_v43 = vpop.permute.xlu0 %516  ;;  %v2838_v59 = vpop.permute.xlu1 %510 }
 0x257   : > { %v522_v52 = vmax.f32 %v514_v51, %v517_v43  ;;  %v507_v42 = vmax.f32 %v499_v40, %v2838_v59 }
 0x25a   : > { %v525_v46 = vpop.permute.xlu0 %524  ;;  %v2846_v0 = vpop.permute.xlu1 %518 }
 0x25b   : > { %v530_v55 = vmax.f32 %v522_v52, %v525_v46  ;;  %v515_v45 = vmax.f32 %v507_v42, %v2846_v0 }
 0x25e   : > { %v533_v50 = vpop.permute.xlu0 %532  ;;  %v2850_v4 = vpop.permute.xlu1 %526 }
 0x25f   : > { %v538_v56 = vmax.f32 %v530_v55, %v533_v50  ;;  %v523_v48 = vmax.f32 %v515_v45, %v2850_v4 }
 0x262   : > { %v541_v54 = vpop.permute.xlu0 %540  ;;  %v535_v6 = vpop.permute.xlu1 %534 }
 0x263   : > { %v546_v58 = vmax.f32 %v538_v56, %v541_v54  ;;  %v531_v51 = vmax.f32 %v523_v48, %v535_v6 }
 0x266   : > { %v549_v57 = vpop.permute.xlu0 %548  ;;  %v2858_v9 = vpop.permute.xlu1 %542 }
 0x267   : > { %v554_v60 = vmax.f32 %v546_v58, %v549_v57  ;;  %v539_v54 = vmax.f32 %v531_v51, %v2858_v9 }
 0x26a   : > { %v557_v61 = vpop.permute.xlu0 %556  ;;  %v551_v11 = vpop.permute.xlu1 %550 }
 0x26b   : > { %v2840_v62 = vmax.f32 %v554_v60, %v557_v61  ;;  %v547_v56 = vmax.f32 %v539_v54, %v551_v11 }
 0x26d   : > { %572 = vrot.lane.b32.xlu0 %v2840_v62, %s2579_s23 }
 0x26e   : > { %v1191_v2 = vpop.permute.xlu0 %1190  ;;  %v559_v15 = vpop.permute.xlu1 %558 }
 0x26f   : > { %v1196_v14 = vmax.f32 %v2701_v22, %v1191_v2  ;;  %v555_v60 = vmax.f32 %v547_v56, %v559_v15 }
 0x271   : > { %584 = vrot.lane.b32.xlu0 %v2840_v62, %s2580_s24 }
 0x272   : > { %v1199_v3 = vpop.permute.xlu0 %1198  ;;  %v2871_v20 = vpop.permute.xlu1 %1192 }
 0x273   : > { %v1204_v16 = vmax.f32 %v1196_v14, %v1199_v3 }
 0x275   : > { %596 = vrot.lane.b32.xlu0 %v2840_v62, %s2581_s25 }
 0x276   : > { %v1207_v5 = vpop.permute.xlu0 %1206  ;;  %v2879_v36 = vpop.permute.xlu1 %1200 }
 0x277   : > { %v1212_v18 = vmax.f32 %v1204_v16, %v1207_v5 }
 0x279   : > { %608 = vrot.lane.b32.xlu0 %v2840_v62, %s4045_s12 }
 0x27a   : > { %v1215_v7 = vpop.permute.xlu0 %1214  ;;  %v1209_v38 = vpop.permute.xlu1 %1208 }
 0x27b   : > { %v1220_v19 = vmax.f32 %v1212_v18, %v1215_v7 }
 0x27d   : > { %620 = vrot.lane.b32.xlu0 %v2840_v62, %s4047_s22 }
 0x27e   : > { %v1223_v8 = vpop.permute.xlu0 %1222  ;;  %v1217_v50 = vpop.permute.xlu1 %1216 }
 0x27f   : > { %v1228_v27 = vmax.f32 %v1220_v19, %v1223_v8  ;;  %v1197_v8 = vmax.f32 %v2705_v24, %v2871_v20 }
 0x281   : > { %632 = vrot.lane.b32.xlu0 %v2840_v62, %s4049_s21 }
 0x282   : > { %v1231_v10 = vpop.permute.xlu0 %1230  ;;  %v1225_v58 = vpop.permute.xlu1 %1224 }
 0x283   : > { %v1236_v30 = vmax.f32 %v1228_v27, %v1231_v10  ;;  %v1205_v10 = vmax.f32 %v1197_v8, %v2879_v36 }
 0x285   : > { %644 = vrot.lane.b32.xlu0 %v2840_v62, %s4051_s20  ;;  %v1213_v11 = vmax.f32 %v1205_v10, %v1209_v38 }
 0x286   : > { %v1239_v12 = vpop.permute.xlu0 %1238  ;;  %v1233_v3 = vpop.permute.xlu1 %1232 }
 0x287   : > { %v1244_v35 = vmax.f32 %v1236_v30, %v1239_v12  ;;  %v1221_v12 = vmax.f32 %v1213_v11, %v1217_v50 }
 0x289   : > { %656 = vrot.lane.b32.xlu0 %v2840_v62, %s4053_s19  ;;  %v1229_v14 = vmax.f32 %v1221_v12, %v1225_v58 }
 0x28a   : > { %v1247_v13 = vpop.permute.xlu0 %1246  ;;  %v1241_v4 = vpop.permute.xlu1 %1240 }
 0x28b   : > { %v1252_v39 = vmax.f32 %v1244_v35, %v1247_v13  ;;  %v1237_v15 = vmax.f32 %v1229_v14, %v1233_v3 }
 0x28d   : > { %668 = vrot.lane.b32.xlu0 %v2840_v62, %s4055_s18  ;;  %v1245_v16 = vmax.f32 %v1237_v15, %v1241_v4 }
 0x28e   : > { %v1255_v17 = vpop.permute.xlu0 %1254  ;;  %v1249_v5 = vpop.permute.xlu1 %1248 }
 0x28f   : > { %v1260_v33 = vmax.f32 %v1252_v39, %v1255_v17  ;;  %v1253_v18 = vmax.f32 %v1245_v16, %v1249_v5 }
 0x291   : > { %680 = vrot.lane.b32.xlu0 %v2840_v62, %s4057_s16 }
 0x292   : > { %v1263_v25 = vpop.permute.xlu0 %1262  ;;  %v1257_v6 = vpop.permute.xlu1 %1256 }
 0x293   : > { %v1268_v41 = vmax.f32 %v1260_v33, %v1263_v25  ;;  %v1261_v19 = vmax.f32 %v1253_v18, %v1257_v6 }
 0x295   : > { %692 = vrot.lane.b32.xlu0 %v2840_v62, %s4059_s15 }
 0x296   : > { %v1271_v32 = vpop.permute.xlu0 %1270  ;;  %v1265_v7 = vpop.permute.xlu1 %1264 }
 0x297   : > { %v1276_v44 = vmax.f32 %v1268_v41, %v1271_v32  ;;  %v1269_v20 = vmax.f32 %v1261_v19, %v1265_v7 }
 0x299   : > { %704 = vrot.lane.b32.xlu0 %v2840_v62, %s4061_s14 }
 0x29a   : > { %v1279_v28 = vpop.permute.xlu0 %1278  ;;  %v1273_v9 = vpop.permute.xlu1 %1272 }
 0x29b   : > { %v1284_v46 = vmax.f32 %v1276_v44, %v1279_v28  ;;  %v1277_v29 = vmax.f32 %v1269_v20, %v1273_v9 }
 0x29d   : > { %716 = vrot.lane.b32.xlu0 %v2840_v62, %s4063_s13 }
 0x29e   : > { %v1287_v43 = vpop.permute.xlu0 %1286  ;;  %v1281_v13 = vpop.permute.xlu1 %1280 }
 0x29f   : > { %v1292_v49 = vmax.f32 %v1284_v46, %v1287_v43  ;;  %v1285_v32 = vmax.f32 %v1277_v29, %v1281_v13 }
 0x2a1   : > { %728 = vrot.lane.b32.xlu0 %v2840_v62, %s4065_s11 }
 0x2a2   : > { %v1295_v47 = vpop.permute.xlu0 %1294  ;;  %v1289_v17 = vpop.permute.xlu1 %1288 }
 0x2a3   : > { %v1300_v52 = vmax.f32 %v1292_v49, %v1295_v47  ;;  %v1293_v36 = vmax.f32 %v1285_v32, %v1289_v17 }
 0x2a5   : > { %740 = vrot.lane.b32.xlu0 %v2840_v62, %s2593_s10 }
 0x2a6   : > { %v1303_v53 = vpop.permute.xlu0 %1302  ;;  %v1297_v26 = vpop.permute.xlu1 %1296 }
 0x2a7   : > { %v2896_v55 = vmax.f32 %v1300_v52, %v1303_v53  ;;  %v1301_v28 = vmax.f32 %v1293_v36, %v1297_v26 }
 0x2a9   : > { %1318 = vrot.lane.b32.xlu0 %v2896_v55, %s2579_s23 }
 0x2aa   : > { %v447_v59 = vpop.permute.xlu0 %446  ;;  %v1305_v37 = vpop.permute.xlu1 %1304 }
 0x2ab   : > { %v451_v61 = vmax.f32 %v2703_v23, %v447_v59  ;;  %v2971_v40 = vmax.f32 %v1301_v28, %v1305_v37 }
 0x2ad   : > { %v2903_v0 = vmax.f32 %v555_v60, %v451_v61  ;;  %1330 = vrot.lane.b32.xlu0 %v2896_v55, %s2580_s24 }
 0x2af   : > { %574 = vrot.lane.b32.xlu1 %v2903_v0, %s2579_s23 }
 0x2b1   : > { %1342 = vrot.lane.b32.xlu0 %v2896_v55, %s2581_s25 }
 0x2b3   : > { %586 = vrot.lane.b32.xlu1 %v2903_v0, %s2580_s24 }
 0x2b5   : > { %1354 = vrot.lane.b32.xlu0 %v2896_v55, %s4045_s12 }
 0x2b7   : > { %598 = vrot.lane.b32.xlu1 %v2903_v0, %s2581_s25 }
 0x2b9   : > { %1366 = vrot.lane.b32.xlu0 %v2896_v55, %s4047_s22 }
 0x2bb   : > { %610 = vrot.lane.b32.xlu1 %v2903_v0, %s4045_s12 }
 0x2bd   : > { %1378 = vrot.lane.b32.xlu0 %v2896_v55, %s4049_s21 }
 0x2bf   : > { %622 = vrot.lane.b32.xlu1 %v2903_v0, %s4047_s22 }
 0x2c1   : > { %1390 = vrot.lane.b32.xlu0 %v2896_v55, %s4051_s20 }
 0x2c3   : > { %634 = vrot.lane.b32.xlu1 %v2903_v0, %s4049_s21 }
 0x2c5   : > { %1402 = vrot.lane.b32.xlu0 %v2896_v55, %s4053_s19 }
 0x2c7   : > { %646 = vrot.lane.b32.xlu1 %v2903_v0, %s4051_s20 }
 0x2c9   : > { %1414 = vrot.lane.b32.xlu0 %v2896_v55, %s4055_s18 }
 0x2cb   : > { %658 = vrot.lane.b32.xlu1 %v2903_v0, %s4053_s19 }
 0x2cd   : > { %1426 = vrot.lane.b32.xlu0 %v2896_v55, %s4057_s16 }
 0x2cf   : > { %670 = vrot.lane.b32.xlu1 %v2903_v0, %s4055_s18 }
 0x2d1   : > { %1438 = vrot.lane.b32.xlu0 %v2896_v55, %s4059_s15 }
 0x2d3   : > { %682 = vrot.lane.b32.xlu1 %v2903_v0, %s4057_s16 }
 0x2d5   : > { %1450 = vrot.lane.b32.xlu0 %v2896_v55, %s4061_s14 }
 0x2d7   : > { %694 = vrot.lane.b32.xlu1 %v2903_v0, %s4059_s15 }
 0x2d9   : > { %1462 = vrot.lane.b32.xlu0 %v2896_v55, %s4063_s13 }
 0x2db   : > { %706 = vrot.lane.b32.xlu1 %v2903_v0, %s4061_s14 }
 0x2dd   : > { %1474 = vrot.lane.b32.xlu0 %v2896_v55, %s4065_s11 }
 0x2df   : > { %v573_v25 = vpop.permute.xlu0 %572  ;;  %718 = vrot.lane.b32.xlu1 %v2903_v0, %s4063_s13 }
 0x2e0   : > { %v578_v27 = vsub.f32 %v2695_v21, %v573_v25 }
 0x2e1   : > { %1486 = vrot.lane.b32.xlu0 %v2896_v55, %s2593_s10 }
 0x2e2   : > { %v580_v30 = vmul.f32 1.442695, %v578_v27 }
 0x2e3   : > { %v585_v34 = vpop.permute.xlu0 %584  ;;  %730 = vrot.lane.b32.xlu1 %v2903_v0, %s4065_s11 }
 0x2e4   : > { %2407 = vpow2.f32 %v580_v30  ;;  %v590_v35 = vsub.f32 %v2695_v21, %v585_v34 }
 0x2e6   : > { %v592_v39 = vmul.f32 1.442695, %v590_v35 }
 0x2e7   : > { %v597_v31 = vpop.permute.xlu0 %596  ;;  %742 = vrot.lane.b32.xlu1 %v2903_v0, %s2593_s10 }
 0x2e8   : > { %2409 = vpow2.f32 %v592_v39  ;;  %v602_v33 = vsub.f32 %v2695_v21, %v597_v31 }
 0x2ea   : > { %v604_v41 = vmul.f32 1.442695, %v602_v33 }
 0x2eb   : > { %v609_v38 = vpop.permute.xlu0 %608  ;;  %1320 = vrot.lane.b32.xlu1 %v2971_v40, %s2579_s23 }
 0x2ec   : > { %2411 = vpow2.f32 %v604_v41  ;;  %v614_v43 = vsub.f32 %v2695_v21, %v609_v38 }
 0x2ee   : > { %v2976_v42 = vpop.eup %2407  ;;  %v616_v44 = vmul.f32 1.442695, %v614_v43 }
 0x2ef   : > { %754 = vrot.lane.b32.xlu0 %v2976_v42, %s2565_s28  ;;  %v621_v45 = vpop.permute.xlu0 %620  ;;  %1332 = vrot.lane.b32.xlu1 %v2971_v40, %s2580_s24 }
 0x2f0   : > { %2413 = vpow2.f32 %v616_v44  ;;  %v626_v46 = vsub.f32 %v2695_v21, %v621_v45 }
 0x2f2   : > { %v2983_v47 = vpop.eup %2409  ;;  %v628_v48 = vmul.f32 1.442695, %v626_v46 }
 0x2f3   : > { %764 = vrot.lane.b32.xlu0 %v2983_v47, %s2564_s26  ;;  %v633_v49 = vpop.permute.xlu0 %632  ;;  %1344 = vrot.lane.b32.xlu1 %v2971_v40, %s2581_s25 }
 0x2f4   : > { %2415 = vpow2.f32 %v628_v48  ;;  %v638_v50 = vsub.f32 %v2695_v21, %v633_v49 }
 0x2f6   : > { %v2990_v51 = vpop.eup %2411  ;;  %v640_v52 = vmul.f32 1.442695, %v638_v50 }
 0x2f7   : > { %774 = vrot.lane.b32.xlu0 %v2990_v51, %s2566_s29  ;;  %v645_v53 = vpop.permute.xlu0 %644  ;;  %1356 = vrot.lane.b32.xlu1 %v2971_v40, %s4045_s12  ;;  %s4101_s12 = smov 108  }
 0x2f8   : > { %2417 = vpow2.f32 %v640_v52  ;;  %v650_v54 = vsub.f32 %v2695_v21, %v645_v53 }
 0x2fa   : > { %v2997_v56 = vpop.eup %2413  ;;  %v652_v58 = vmul.f32 1.442695, %v650_v54 }
 0x2fb   : > { %784 = vrot.lane.b32.xlu0 %v2997_v56, %s2567_s30  ;;  %v657_v59 = vpop.permute.xlu0 %656  ;;  %1368 = vrot.lane.b32.xlu1 %v2971_v40, %s4047_s22  ;;  %s4102_s22 = smov 104  }
 0x2fc   : > { %2419 = vpow2.f32 %v652_v58  ;;  %v662_v60 = vsub.f32 %v2695_v21, %v657_v59 }
 0x2fe   : > { %v3004_v61 = vpop.eup %2415  ;;  %v664_v3 = vmul.f32 1.442695, %v662_v60 }
 0x2ff   : > { %794 = vrot.lane.b32.xlu0 %v3004_v61, %s4101_s12  ;;  %v669_v4 = vpop.permute.xlu0 %668  ;;  %1380 = vrot.lane.b32.xlu1 %v2971_v40, %s4049_s21  ;;  %s4103_s21 = smov 100  }
 0x300   : > { %2421 = vpow2.f32 %v664_v3  ;;  %v674_v5 = vsub.f32 %v2695_v21, %v669_v4 }
 0x302   : > { %v3011_v6 = vpop.eup %2417  ;;  %v676_v7 = vmul.f32 1.442695, %v674_v5 }
 0x303   : > { %804 = vrot.lane.b32.xlu0 %v3011_v6, %s4102_s22  ;;  %v681_v8 = vpop.permute.xlu0 %680  ;;  %1392 = vrot.lane.b32.xlu1 %v2971_v40, %s4051_s20  ;;  %s4104_s20 = smov 96  }
 0x304   : > { %2423 = vpow2.f32 %v676_v7  ;;  %v686_v9 = vsub.f32 %v2695_v21, %v681_v8 }
 0x306   : > { %v3018_v10 = vpop.eup %2419  ;;  %v688_v11 = vmul.f32 1.442695, %v686_v9 }
 0x307   : > { %814 = vrot.lane.b32.xlu0 %v3018_v10, %s4103_s21  ;;  %v693_v12 = vpop.permute.xlu0 %692  ;;  %1404 = vrot.lane.b32.xlu1 %v2971_v40, %s4053_s19  ;;  %s4105_s19 = smov 92  }
 0x308   : > { %2425 = vpow2.f32 %v688_v11  ;;  %v698_v13 = vsub.f32 %v2695_v21, %v693_v12 }
 0x30a   : > { %v3025_v14 = vpop.eup %2421  ;;  %v700_v15 = vmul.f32 1.442695, %v698_v13 }
 0x30b   : > { %824 = vrot.lane.b32.xlu0 %v3025_v14, %s4104_s20  ;;  %v705_v16 = vpop.permute.xlu0 %704  ;;  %1416 = vrot.lane.b32.xlu1 %v2971_v40, %s4055_s18  ;;  %s4106_s18 = smov 88  }
 0x30c   : > { %2427 = vpow2.f32 %v700_v15  ;;  %v710_v17 = vsub.f32 %v2695_v21, %v705_v16 }
 0x30e   : > { %v3032_v18 = vpop.eup %2423  ;;  %v712_v19 = vmul.f32 1.442695, %v710_v17 }
 0x30f   : > { %834 = vrot.lane.b32.xlu0 %v3032_v18, %s4105_s19  ;;  %v717_v20 = vpop.permute.xlu0 %716  ;;  %1428 = vrot.lane.b32.xlu1 %v2971_v40, %s4057_s16  ;;  %s4107_s16 = smov 84  }
 0x310   : > { %2429 = vpow2.f32 %v712_v19  ;;  %v722_v25 = vsub.f32 %v2695_v21, %v717_v20 }
 0x312   : > { %v3039_v26 = vpop.eup %2425  ;;  %v724_v27 = vmul.f32 1.442695, %v722_v25 }
 0x313   : > { %844 = vrot.lane.b32.xlu0 %v3039_v26, %s4106_s18  ;;  %v729_v29 = vpop.permute.xlu0 %728  ;;  %1440 = vrot.lane.b32.xlu1 %v2971_v40, %s4059_s15  ;;  %s4108_s15 = smov 80  }
 0x314   : > { %2431 = vpow2.f32 %v724_v27  ;;  %v734_v30 = vsub.f32 %v2695_v21, %v729_v29 }
 0x316   : > { %v3046_v32 = vpop.eup %2427  ;;  %v736_v34 = vmul.f32 1.442695, %v734_v30 }
 0x317   : > { %854 = vrot.lane.b32.xlu0 %v3046_v32, %s4107_s16  ;;  %v741_v35 = vpop.permute.xlu0 %740  ;;  %1452 = vrot.lane.b32.xlu1 %v2971_v40, %s4061_s14  ;;  %s4109_s14 = smov 76  }
 0x318   : > { %2433 = vpow2.f32 %v736_v34  ;;  %v746_v36 = vsub.f32 %v2695_v21, %v741_v35 }
 0x31a   : > { %v3053_v37 = vpop.eup %2429  ;;  %v748_v39 = vmul.f32 1.442695, %v746_v36 }
 0x31b   : > { %864 = vrot.lane.b32.xlu0 %v3053_v37, %s4108_s15  ;;  %v1319_v28 = vpop.permute.xlu0 %1318  ;;  %1464 = vrot.lane.b32.xlu1 %v2971_v40, %s4063_s13  ;;  %s4110_s13 = smov 72  }
 0x31c   : > { %2435 = vpow2.f32 %v748_v39  ;;  %v1324_v31 = vsub.f32 %v2701_v22, %v1319_v28 }
 0x31e   : > { %v3060_v33 = vpop.eup %2431  ;;  %v1326_v41 = vmul.f32 1.442695, %v1324_v31 }
 0x31f   : > { %874 = vrot.lane.b32.xlu0 %v3060_v33, %s4109_s14  ;;  %v1331_v38 = vpop.permute.xlu0 %1330  ;;  %1476 = vrot.lane.b32.xlu1 %v2971_v40, %s4065_s11  ;;  %s4111_s11 = smov 68  }
 0x320   : > { %2437 = vpow2.f32 %v1326_v41  ;;  %v1336_v43 = vsub.f32 %v2701_v22, %v1331_v38 }
 0x321   : > { %v575_v44 = vpop.permute.xlu1 %574 }
 0x322   : > { %v3067_v45 = vpop.eup %2433  ;;  %v1338_v46 = vmul.f32 1.442695, %v1336_v43  ;;  %v579_v48 = vsub.f32 %v2703_v23, %v575_v44 }
 0x323   : > { %884 = vrot.lane.b32.xlu0 %v3067_v45, %s4110_s13  ;;  %v1343_v49 = vpop.permute.xlu0 %1342  ;;  %1488 = vrot.lane.b32.xlu1 %v2971_v40, %s2593_s10 }
 0x324   : > { %2439 = vpow2.f32 %v1338_v46  ;;  %v1348_v50 = vsub.f32 %v2701_v22, %v1343_v49  ;;  %v582_v52 = vmul.f32 1.442695, %v579_v48 }
 0x325   : > { %v587_v53 = vpop.permute.xlu1 %586 }
 0x326   : > { %v3075_v54 = vpop.eup %2435  ;;  %v1350_v58 = vmul.f32 1.442695, %v1348_v50  ;;  %2441 = vpow2.f32 %v582_v52  ;;  %v591_v59 = vsub.f32 %v2703_v23, %v587_v53 }
 0x327   : > { %894 = vrot.lane.b32.xlu0 %v3075_v54, %s4111_s11  ;;  %v1355_v60 = vpop.permute.xlu0 %1354 }
 0x328   : > { %2443 = vpow2.f32 %v1350_v58  ;;  %v1360_v3 = vsub.f32 %v2701_v22, %v1355_v60  ;;  %v594_v4 = vmul.f32 1.442695, %v591_v59 }
 0x329   : > { %v599_v5 = vpop.permute.xlu1 %598 }
 0x32a   : > { %v3081_v7 = vpop.eup %2437  ;;  %v1362_v8 = vmul.f32 1.442695, %v1360_v3  ;;  %2445 = vpow2.f32 %v594_v4  ;;  %v603_v9 = vsub.f32 %v2703_v23, %v599_v5 }
 0x32b   : > { %1500 = vrot.lane.b32.xlu0 %v3081_v7, %s2565_s28  ;;  %v1367_v11 = vpop.permute.xlu0 %1366 }
 0x32c   : > { %2447 = vpow2.f32 %v1362_v8  ;;  %v1372_v12 = vsub.f32 %v2701_v22, %v1367_v11  ;;  %v606_v13 = vmul.f32 1.442695, %v603_v9 }
 0x32d   : > { %v611_v15 = vpop.permute.xlu1 %610 }
 0x32e   : > { %v3087_v16 = vpop.eup %2439  ;;  %v1374_v17 = vmul.f32 1.442695, %v1372_v12  ;;  %2449 = vpow2.f32 %v606_v13  ;;  %v615_v19 = vsub.f32 %v2703_v23, %v611_v15 }
 0x32f   : > { %1510 = vrot.lane.b32.xlu0 %v3087_v16, %s2564_s26  ;;  %v1379_v20 = vpop.permute.xlu0 %1378 }
 0x330   : > { %v3092_v25 = vpop.eup %2441  ;;  %2451 = vpow2.f32 %v1374_v17  ;;  %v1384_v27 = vsub.f32 %v2701_v22, %v1379_v20  ;;  %v618_v29 = vmul.f32 1.442695, %v615_v19 }
 0x331   : > { %756 = vrot.lane.b32.xlu1 %v3092_v25, %s2565_s28  ;;  %v623_v30 = vpop.permute.xlu1 %622 }
 0x332   : > { %v3097_v34 = vpop.eup %2443  ;;  %v1386_v35 = vmul.f32 1.442695, %v1384_v27  ;;  %2453 = vpow2.f32 %v618_v29  ;;  %v627_v36 = vsub.f32 %v2703_v23, %v623_v30 }
 0x333   : > { %1520 = vrot.lane.b32.xlu0 %v3097_v34, %s2566_s29  ;;  %v1391_v39 = vpop.permute.xlu0 %1390 }
 0x334   : > { %v3102_v28 = vpop.eup %2445  ;;  %2455 = vpow2.f32 %v1386_v35  ;;  %v1396_v31 = vsub.f32 %v2701_v22, %v1391_v39  ;;  %v630_v41 = vmul.f32 1.442695, %v627_v36 }
 0x335   : > { %766 = vrot.lane.b32.xlu1 %v3102_v28, %s2564_s26  ;;  %v635_v38 = vpop.permute.xlu1 %634 }
 0x336   : > { %v3107_v43 = vpop.eup %2447  ;;  %v1398_v44 = vmul.f32 1.442695, %v1396_v31  ;;  %2457 = vpow2.f32 %v630_v41  ;;  %v639_v46 = vsub.f32 %v2703_v23, %v635_v38 }
 0x337   : > { %1530 = vrot.lane.b32.xlu0 %v3107_v43, %s2567_s30  ;;  %v1403_v48 = vpop.permute.xlu0 %1402 }
 0x338   : > { %v3112_v49 = vpop.eup %2449  ;;  %2459 = vpow2.f32 %v1398_v44  ;;  %v1408_v50 = vsub.f32 %v2701_v22, %v1403_v48  ;;  %v642_v52 = vmul.f32 1.442695, %v639_v46 }
 0x339   : > { %776 = vrot.lane.b32.xlu1 %v3112_v49, %s2566_s29  ;;  %v647_v53 = vpop.permute.xlu1 %646 }
 0x33a   : > { %v3117_v58 = vpop.eup %2451  ;;  %v1410_v59 = vmul.f32 1.442695, %v1408_v50  ;;  %2461 = vpow2.f32 %v642_v52  ;;  %v651_v60 = vsub.f32 %v2703_v23, %v647_v53 }
 0x33b   : > { %1540 = vrot.lane.b32.xlu0 %v3117_v58, %s4101_s12  ;;  %v1415_v3 = vpop.permute.xlu0 %1414 }
 0x33c   : > { %v3122_v4 = vpop.eup %2453  ;;  %2463 = vpow2.f32 %v1410_v59  ;;  %v1420_v5 = vsub.f32 %v2701_v22, %v1415_v3  ;;  %v654_v8 = vmul.f32 1.442695, %v651_v60 }
 0x33d   : > { %786 = vrot.lane.b32.xlu1 %v3122_v4, %s2567_s30  ;;  %v659_v9 = vpop.permute.xlu1 %658 }
 0x33e   : > { %v3127_v11 = vpop.eup %2455  ;;  %v1422_v12 = vmul.f32 1.442695, %v1420_v5  ;;  %2465 = vpow2.f32 %v654_v8  ;;  %v663_v13 = vsub.f32 %v2703_v23, %v659_v9 }
 0x33f   : > { %1550 = vrot.lane.b32.xlu0 %v3127_v11, %s4102_s22  ;;  %v1427_v15 = vpop.permute.xlu0 %1426 }
 0x340   : > { %v3132_v17 = vpop.eup %2457  ;;  %2467 = vpow2.f32 %v1422_v12  ;;  %v1432_v19 = vsub.f32 %v2701_v22, %v1427_v15  ;;  %v666_v20 = vmul.f32 1.442695, %v663_v13 }
 0x341   : > { %796 = vrot.lane.b32.xlu1 %v3132_v17, %s4101_s12  ;;  %v671_v27 = vpop.permute.xlu1 %670 }
 0x342   : > { %v3137_v29 = vpop.eup %2459  ;;  %v1434_v30 = vmul.f32 1.442695, %v1432_v19  ;;  %2469 = vpow2.f32 %v666_v20  ;;  %v675_v35 = vsub.f32 %v2703_v23, %v671_v27 }
 0x343   : > { %1560 = vrot.lane.b32.xlu0 %v3137_v29, %s4103_s21  ;;  %v1439_v36 = vpop.permute.xlu0 %1438 }
 0x344   : > { %v3142_v39 = vpop.eup %2461  ;;  %2471 = vpow2.f32 %v1434_v30  ;;  %v1444_v31 = vsub.f32 %v2701_v22, %v1439_v36  ;;  %v678_v41 = vmul.f32 1.442695, %v675_v35 }
 0x345   : > { %806 = vrot.lane.b32.xlu1 %v3142_v39, %s4102_s22  ;;  %v683_v38 = vpop.permute.xlu1 %682 }
 0x346   : > { %v3147_v44 = vpop.eup %2463  ;;  %v1446_v46 = vmul.f32 1.442695, %v1444_v31  ;;  %2473 = vpow2.f32 %v678_v41  ;;  %v687_v48 = vsub.f32 %v2703_v23, %v683_v38 }
 0x347   : > { %1570 = vrot.lane.b32.xlu0 %v3147_v44, %s4104_s20  ;;  %v1451_v50 = vpop.permute.xlu0 %1450 }
 0x348   : > { %v3152_v52 = vpop.eup %2465  ;;  %2475 = vpow2.f32 %v1446_v46  ;;  %v1456_v53 = vsub.f32 %v2701_v22, %v1451_v50  ;;  %v690_v59 = vmul.f32 1.442695, %v687_v48 }
 0x349   : > { %4112 = vst [vmem:[#allocation2_spill] sm:$0xff] %v3152_v52  ;;  %816 = vrot.lane.b32.xlu1 %v3152_v52, %s4103_s21  ;;  %v695_v60 = vpop.permute.xlu1 %694 }
 0x34a   : > { %v3157_v3 = vpop.eup %2467  ;;  %v1458_v5 = vmul.f32 1.442695, %v1456_v53  ;;  %2477 = vpow2.f32 %v690_v59  ;;  %v699_v8 = vsub.f32 %v2703_v23, %v695_v60 }
 0x34b   : > { %4113 = vst [vmem:[#allocation3_spill] sm:$0xff] %v3157_v3  ;;  %1580 = vrot.lane.b32.xlu0 %v3157_v3, %s4105_s19  ;;  %v1463_v9 = vpop.permute.xlu0 %1462 }
 0x34c   : > { %v3162_v12 = vpop.eup %2469  ;;  %2479 = vpow2.f32 %v1458_v5  ;;  %v1468_v13 = vsub.f32 %v2701_v22, %v1463_v9  ;;  %v702_v15 = vmul.f32 1.442695, %v699_v8 }
 0x34d   : > { %4114 = vst [vmem:[#allocation4_spill] sm:$0xff] %v3162_v12  ;;  %826 = vrot.lane.b32.xlu1 %v3162_v12, %s4104_s20  ;;  %v707_v19 = vpop.permute.xlu1 %706 }
 0x34e   : > { %v3167_v20 = vpop.eup %2471  ;;  %v1470_v27 = vmul.f32 1.442695, %v1468_v13  ;;  %2481 = vpow2.f32 %v702_v15  ;;  %v711_v30 = vsub.f32 %v2703_v23, %v707_v19 }
 0x34f   : > { %4115 = vst [vmem:[#allocation5_spill] sm:$0xff] %v3167_v20  ;;  %1590 = vrot.lane.b32.xlu0 %v3167_v20, %s4106_s18  ;;  %v1475_v35 = vpop.permute.xlu0 %1474 }
 0x350   : > { %v3172_v36 = vpop.eup %2473  ;;  %2483 = vpow2.f32 %v1470_v27  ;;  %v1480_v31 = vsub.f32 %v2701_v22, %v1475_v35  ;;  %v714_v41 = vmul.f32 1.442695, %v711_v30 }
 0x351   : > { %4116 = vst [vmem:[#allocation6_spill] sm:$0xff] %v3172_v36  ;;  %836 = vrot.lane.b32.xlu1 %v3172_v36, %s4105_s19  ;;  %v719_v38 = vpop.permute.xlu1 %718 }
 0x352   : > { %v3177_v46 = vpop.eup %2475  ;;  %v1482_v48 = vmul.f32 1.442695, %v1480_v31  ;;  %2485 = vpow2.f32 %v714_v41  ;;  %v723_v50 = vsub.f32 %v2703_v23, %v719_v38 }
 0x353   : > { %4117 = vst [vmem:[#allocation7_spill] sm:$0xff] %v3177_v46  ;;  %1600 = vrot.lane.b32.xlu0 %v3177_v46, %s4107_s16  ;;  %v1487_v53 = vpop.permute.xlu0 %1486 }
 0x354   : > { %v3182_v59 = vpop.eup %2477  ;;  %2487 = vpow2.f32 %v1482_v48  ;;  %v1492_v60 = vsub.f32 %v2701_v22, %v1487_v53  ;;  %v726_v5 = vmul.f32 1.442695, %v723_v50 }
 0x355   : > { %4118 = vst [vmem:[#allocation8_spill] sm:$0xff] %v3182_v59  ;;  %846 = vrot.lane.b32.xlu1 %v3182_v59, %s4106_s18  ;;  %v731_v8 = vpop.permute.xlu1 %730 }
 0x356   : > { %v3187_v9 = vpop.eup %2479  ;;  %v1494_v13 = vmul.f32 1.442695, %v1492_v60  ;;  %2489 = vpow2.f32 %v726_v5  ;;  %v735_v15 = vsub.f32 %v2703_v23, %v731_v8 }
 0x357   : > { %4119 = vst [vmem:[#allocation9_spill] sm:$0xff] %v3187_v9  ;;  %1610 = vrot.lane.b32.xlu0 %v3187_v9, %s4108_s15 }
 0x358   : > { %v3192_v19 = vpop.eup %2481  ;;  %2491 = vpow2.f32 %v1494_v13  ;;  %v738_v27 = vmul.f32 1.442695, %v735_v15 }
 0x359   : > { %4120 = vst [vmem:[#allocation10_spill] sm:$0xff] %v3192_v19  ;;  %856 = vrot.lane.b32.xlu1 %v3192_v19, %s4107_s16  ;;  %v743_v30 = vpop.permute.xlu1 %742 }
 0x35a   : > { %v3196_v35 = vpop.eup %2483  ;;  %2493 = vpow2.f32 %v738_v27  ;;  %v747_v31 = vsub.f32 %v2703_v23, %v743_v30 }
 0x35b   : > { %4121 = vst [vmem:[#allocation11_spill] sm:$0xff] %v3196_v35  ;;  %1620 = vrot.lane.b32.xlu0 %v3196_v35, %s4109_s14 }
 0x35c   : > { %v3201_v41 = vpop.eup %2485  ;;  %v750_v38 = vmul.f32 1.442695, %v747_v31 }
 0x35d   : > { %4122 = vst [vmem:[#allocation12_spill] sm:$0xff] %v3201_v41  ;;  %866 = vrot.lane.b32.xlu1 %v3201_v41, %s4108_s15  ;;  %v1321_v48 = vpop.permute.xlu1 %1320 }
 0x35e   : > { %v3205_v50 = vpop.eup %2487  ;;  %2495 = vpow2.f32 %v750_v38  ;;  %v1325_v53 = vsub.f32 %v2705_v24, %v1321_v48 }
 0x35f   : > { %4123 = vst [vmem:[#allocation13_spill] sm:$0xff] %v3205_v50  ;;  %1630 = vrot.lane.b32.xlu0 %v3205_v50, %s4110_s13 }
 0x360   : > { %v3210_v60 = vpop.eup %2489  ;;  %v1328_v5 = vmul.f32 1.442695, %v1325_v53 }
 0x361   : > { %4124 = vst [vmem:[#allocation14_spill] sm:$0xff] %v3210_v60  ;;  %v755_v8 = vpop.permute.xlu0 %754  ;;  %876 = vrot.lane.b32.xlu1 %v3210_v60, %s4109_s14  ;;  %v1333_v13 = vpop.permute.xlu1 %1332 }
 0x362   : > { %v3214_v15 = vpop.eup %2491  ;;  %2497 = vpow2.f32 %v1328_v5  ;;  %v1337_v27 = vsub.f32 %v2705_v24, %v1333_v13 }
 0x363   : > { %4125 = vst [vmem:[#allocation15_spill] sm:$0xff] %v3214_v15  ;;  %1640 = vrot.lane.b32.xlu0 %v3214_v15, %s4111_s11 }
 0x364   : > { %v3219_v30 = vpop.eup %2493  ;;  %v1340_v31 = vmul.f32 1.442695, %v1337_v27 }
 0x365   : > { %4126 = vst [vmem:[#allocation16_spill] sm:$0xff] %v3219_v30  ;;  %v765_v38 = vpop.permute.xlu0 %764  ;;  %886 = vrot.lane.b32.xlu1 %v3219_v30, %s4110_s13  ;;  %v1345_v48 = vpop.permute.xlu1 %1344 }
 0x366   : > { %2499 = vpow2.f32 %v1340_v31  ;;  %v1349_v53 = vsub.f32 %v2705_v24, %v1345_v48 }
 0x368   : > { %v3224_v1 = vpop.eup %2495  ;;  %v1352_v2 = vmul.f32 1.442695, %v1349_v53  ;;  %v4129_v53 = vsub.f32 %v2695_v21, %v2840_v62 }
 0x369   : > { %4127 = vst [vmem:[#allocation17_spill] sm:$0xff] %v3224_v1  ;;  %v775_v5 = vpop.permute.xlu0 %774  ;;  %896 = vrot.lane.b32.xlu1 %v3224_v1, %s4111_s11  ;;  %v1357_v13 = vpop.permute.xlu1 %1356 }
 0x36a   : > { %2501 = vpow2.f32 %v1352_v2  ;;  %v1361_v57 = vsub.f32 %v2705_v24, %v1357_v13  ;;  %v566_v30 = vmul.f32 1.442695, %v4129_v53 }
 0x36c   : > { %v3229_v27 = vpop.eup %2497  ;;  %v1364_v63 = vmul.f32 1.442695, %v1361_v57 }
 0x36d   : > { %4128 = vst [vmem:[#allocation18_spill] sm:$0xff] %v3229_v27  ;;  %v785_v15 = vpop.permute.xlu0 %784  ;;  %1502 = vrot.lane.b32.xlu1 %v3229_v27, %s2565_s28  ;;  %v1369_v31 = vpop.permute.xlu1 %1368 }
 0x36e   : > { %2503 = vpow2.f32 %v1364_v63  ;;  %v1373_v48 = vsub.f32 %v2705_v24, %v1369_v31 }
 0x370   : > { %v3237_v1 = vpop.eup %2499  ;;  %v1376_v2 = vmul.f32 1.442695, %v1373_v48 }
 0x371   : > { %4130 = vst [vmem:[#allocation19_spill] sm:$0xff] %v3237_v1  ;;  %v795_v60 = vpop.permute.xlu0 %794  ;;  %1512 = vrot.lane.b32.xlu1 %v3237_v1, %s2564_s26  ;;  %v1381_v57 = vpop.permute.xlu1 %1380  ;;  %s4147_s26 = smov 20  }
 0x372   : > { %2505 = vpow2.f32 %v1376_v2  ;;  %v1385_v13 = vsub.f32 %v2705_v24, %v1381_v57 }
 0x373   : > { %2507 = vpow2.f32 %v566_v30 }
 0x374   : > { %v3242_v27 = vpop.eup %2501  ;;  %v1388_v63 = vmul.f32 1.442695, %v1385_v13 }
 0x375   : > { %4131 = vst [vmem:[#allocation20_spill] sm:$0xff] %v3242_v27  ;;  %v805_v31 = vpop.permute.xlu0 %804  ;;  %1522 = vrot.lane.b32.xlu1 %v3242_v27, %s2566_s29  ;;  %v1393_v21 = vpop.permute.xlu1 %1392  ;;  %s4148_s29 = smov 24  }
 0x376   : > { %2509 = vpow2.f32 %v1388_v63  ;;  %v1397_v62 = vsub.f32 %v2705_v24, %v1393_v21 }
 0x378   : > { %v3247_v48 = vpop.eup %2503  ;;  %v1400_v53 = vmul.f32 1.442695, %v1397_v62 }
 0x379   : > { %4132 = vst [vmem:[#allocation21_spill] sm:$0xff] %v3247_v48  ;;  %v815_v1 = vpop.permute.xlu0 %814  ;;  %1532 = vrot.lane.b32.xlu1 %v3247_v48, %s2567_s30  ;;  %v1405_v2 = vpop.permute.xlu1 %1404  ;;  %s4149_s30 = smov 28  }
 0x37a   : > { %2511 = vpow2.f32 %v1400_v53  ;;  %v1409_v30 = vsub.f32 %v2705_v24, %v1405_v2 }
 0x37c   : > { %v3252_v57 = vpop.eup %2505  ;;  %v1412_v13 = vmul.f32 1.442695, %v1409_v30 }
 0x37d   : > { %4133 = vst [vmem:[#allocation22_spill] sm:$0xff] %v3252_v57  ;;  %v3254_v50 = vpop.eup %2507  ;;  %v825_v27 = vpop.permute.xlu0 %824  ;;  %1542 = vrot.lane.b32.xlu1 %v3252_v57, %s4101_s12  ;;  %s4146_s12 = smov 16  }
 0x37e   : > { %v1417_v63 = vpop.permute.xlu1 %1416  ;;  %v760_v21 = vadd.f32 %v3254_v50, %v755_v8  ;;  %2513 = vpow2.f32 %v1412_v13 }
 0x37f   : > { %v1421_v62 = vsub.f32 %v2705_v24, %v1417_v63 }
 0x380   : > { %v3260_v48 = vpop.eup %2509  ;;  %v770_v53 = vadd.f32 %v765_v38, %v760_v21 }
 0x381   : > { %4134 = vst [vmem:[#allocation23_spill] sm:$0xff] %v3260_v48  ;;  %v1424_v41 = vmul.f32 1.442695, %v1421_v62  ;;  %v835_v2 = vpop.permute.xlu0 %834  ;;  %1552 = vrot.lane.b32.xlu1 %v3260_v48, %s4102_s22 }
 0x382   : > { %v1429_v30 = vpop.permute.xlu1 %1428  ;;  %v780_v35 = vadd.f32 %v775_v5, %v770_v53 }
 0x383   : > { %2515 = vpow2.f32 %v1424_v41  ;;  %v1433_v19 = vsub.f32 %v2705_v24, %v1429_v30 }
 0x384   : > { %v3265_v57 = vpop.eup %2511  ;;  %v790_v9 = vadd.f32 %v785_v15, %v780_v35 }
 0x385   : > { %4135 = vst [vmem:[#allocation24_spill] sm:$0xff] %v3265_v57  ;;  %v1436_v8 = vmul.f32 1.442695, %v1433_v19  ;;  %v845_v13 = vpop.permute.xlu0 %844  ;;  %1562 = vrot.lane.b32.xlu1 %v3265_v57, %s4103_s21 }
 0x386   : > { %v1441_v63 = vpop.permute.xlu1 %1440  ;;  %v800_v38 = vadd.f32 %v795_v60, %v790_v9 }
 0x387   : > { %2517 = vpow2.f32 %v1436_v8  ;;  %v1445_v21 = vsub.f32 %v2705_v24, %v1441_v63 }
 0x388   : > { %v3270_v62 = vpop.eup %2513  ;;  %v810_v48 = vadd.f32 %v805_v31, %v800_v38 }
 0x389   : > { %4136 = vst [vmem:[#allocation25_spill] sm:$0xff] %v3270_v62  ;;  %v1448_v5 = vmul.f32 1.442695, %v1445_v21  ;;  %v855_v41 = vpop.permute.xlu0 %854  ;;  %1572 = vrot.lane.b32.xlu1 %v3270_v62, %s4104_s20  ;;  %s2594_s20 = smov 64  }
 0x38a   : > { %v1453_v53 = vpop.permute.xlu1 %1452  ;;  %v820_v35 = vadd.f32 %v815_v1, %v810_v48 }
 0x38b   : > { %2519 = vpow2.f32 %v1448_v5  ;;  %v1457_v19 = vsub.f32 %v2705_v24, %v1453_v53 }
 0x38c   : > { %v830_v30 = vadd.f32 %v825_v27, %v820_v35 }
 0x38d   : > { %v3275_v15 = vpop.eup %2515  ;;  %v1460_v9 = vmul.f32 1.442695, %v1457_v19  ;;  %v865_v60 = vpop.permute.xlu0 %864 }
 0x38e   : > { %4137 = vst [vmem:[#allocation26_spill] sm:$0xff] %v3275_v15  ;;  %1582 = vrot.lane.b32.xlu1 %v3275_v15, %s4105_s19  ;;  %v1465_v8 = vpop.permute.xlu1 %1464  ;;  %v840_v31 = vadd.f32 %v835_v2, %v830_v30  ;;  %s4156_s19 = smov 56  }
 0x38f   : > { %2521 = vpow2.f32 %v1460_v9  ;;  %v1469_v63 = vsub.f32 %v2705_v24, %v1465_v8 }
 0x390   : > { %v850_v21 = vadd.f32 %v845_v13, %v840_v31 }
 0x391   : > { %v3280_v38 = vpop.eup %2517  ;;  %v1472_v1 = vmul.f32 1.442695, %v1469_v63  ;;  %v875_v48 = vpop.permute.xlu0 %874 }
 0x392   : > { %4138 = vst [vmem:[#allocation27_spill] sm:$0xff] %v3280_v38  ;;  %1592 = vrot.lane.b32.xlu1 %v3280_v38, %s4106_s18  ;;  %v1477_v5 = vpop.permute.xlu1 %1476  ;;  %v860_v27 = vadd.f32 %v855_v41, %v850_v21  ;;  %s4155_s18 = smov 52  }
 0x393   : > { %2523 = vpow2.f32 %v1472_v1  ;;  %v1481_v53 = vsub.f32 %v2705_v24, %v1477_v5 }
 0x394   : > { %v870_v19 = vadd.f32 %v865_v60, %v860_v27 }
 0x395   : > { %v3285_v35 = vpop.eup %2519  ;;  %v1484_v2 = vmul.f32 1.442695, %v1481_v53  ;;  %v885_v30 = vpop.permute.xlu0 %884 }
 0x396   : > { %4139 = vst [vmem:[#allocation28_spill] sm:$0xff] %v3285_v35  ;;  %1602 = vrot.lane.b32.xlu1 %v3285_v35, %s4107_s16  ;;  %v1489_v9 = vpop.permute.xlu1 %1488  ;;  %v880_v13 = vadd.f32 %v875_v48, %v870_v19  ;;  %s4154_s16 = smov 48  }
 0x397   : > { %2525 = vpow2.f32 %v1484_v2  ;;  %v1493_v8 = vsub.f32 %v2705_v24, %v1489_v9 }
 0x398   : > { %v890_v63 = vadd.f32 %v885_v30, %v880_v13 }
 0x399   : > { %v3290_v31 = vpop.eup %2521  ;;  %v1496_v41 = vmul.f32 1.442695, %v1493_v8  ;;  %v895_v21 = vpop.permute.xlu0 %894  ;;  %v4144_v8 = vsub.f32 %v2701_v22, %v2896_v55 }
 0x39a   : > { %4140 = vst [vmem:[#allocation29_spill] sm:$0xff] %v3290_v31  ;;  %1612 = vrot.lane.b32.xlu1 %v3290_v31, %s4108_s15  ;;  %v900_v1 = vadd.f32 %v895_v21, %v890_v63  ;;  %s4153_s15 = smov 44  }
 0x39b   : > { %2527 = vpow2.f32 %v1496_v41  ;;  %v1312_v63 = vmul.f32 1.442695, %v4144_v8 }
 0x39c   : > { %2529 = vrcp.f32 %v900_v1 }
 0x39d   : > { %v3294_v60 = vpop.eup %2523  ;;  %v1501_v5 = vpop.permute.xlu0 %1500  ;;  %2531 = vpow2.f32 %v1312_v63 }
 0x39e   : > { %4141 = vst [vmem:[#allocation30_spill] sm:$0xff] %v3294_v60  ;;  %1622 = vrot.lane.b32.xlu1 %v3294_v60, %s4109_s14  ;;  %s4152_s14 = smov 40  }
 0x3a1   : > { %v3298_v48 = vpop.eup %2525  ;;  %v1511_v27 = vpop.permute.xlu0 %1510 }
 0x3a2   : > { %4142 = vst [vmem:[#allocation31_spill] sm:$0xff] %v3298_v48  ;;  %1632 = vrot.lane.b32.xlu1 %v3298_v48, %s4110_s13  ;;  %v4145_v48 = vsub.f32 %v2703_v23, %v2903_v0  ;;  %s4151_s13 = smov 36  }
 0x3a3   : > { %v757_v53 = vpop.permute.xlu1 %756 }
 0x3a4   : > { %v568_v60 = vmul.f32 1.442695, %v4145_v48 }
 0x3a5   : > { %v3302_v19 = vpop.eup %2527  ;;  %v1521_v2 = vpop.permute.xlu0 %1520 }
 0x3a6   : > { %4143 = vst [vmem:[#allocation32_spill] sm:$0xff] %v3302_v19  ;;  %1642 = vrot.lane.b32.xlu1 %v3302_v19, %s4111_s11  ;;  %v3306_v30 = vpop.eup %2529  ;;  %2533 = vpow2.f32 %v568_v60  ;;  %s4150_s11 = smov 32  }
 0x3a7   : > { %908 = vrot.lane.b32.xlu0 %v3306_v30, %s2579_s23  ;;  %v767_v9 = vpop.permute.xlu1 %766  ;;  %v3324_v63 = vpop.eup %2531 }
 0x3a8   : > { %v1506_v35 = vadd.f32 %v3324_v63, %v1501_v5 }
 0x3a9   : > { %v1531_v13 = vpop.permute.xlu0 %1530 }
 0x3aa   : > { %v1516_v0 = vadd.f32 %v1511_v27, %v1506_v35 }
 0x3ab   : > { %916 = vrot.lane.b32.xlu0 %v3306_v30, %s2580_s24  ;;  %v777_v41 = vpop.permute.xlu1 %776 }
 0x3ac   : > { %v1526_v38 = vadd.f32 %v1521_v2, %v1516_v0 }
 0x3ad   : > { %v1541_v21 = vpop.permute.xlu0 %1540 }
 0x3ae   : > { %v1536_v62 = vadd.f32 %v1531_v13, %v1526_v38 }
 0x3af   : > { %924 = vrot.lane.b32.xlu0 %v3306_v30, %s2581_s25  ;;  %v787_v1 = vpop.permute.xlu1 %786 }
 0x3b0   : > { %v3329_v15 = vpop.eup %2533  ;;  %v1546_v46 = vadd.f32 %v1541_v21, %v1536_v62 }
 0x3b1   : > { %v1551_v19 = vpop.permute.xlu0 %1550  ;;  %v761_v57 = vadd.f32 %v3329_v15, %v757_v53 }
 0x3b2   : > { %v1556_v20 = vadd.f32 %v1551_v19, %v1546_v46 }
 0x3b3   : > { %932 = vrot.lane.b32.xlu0 %v3306_v30, %s4146_s12  ;;  %v797_v22 = vpop.permute.xlu1 %796  ;;  %v771_v36 = vadd.f32 %v767_v9, %v761_v57 }
 0x3b5   : > { %v1561_v55 = vpop.permute.xlu0 %1560  ;;  %v781_v35 = vadd.f32 %v777_v41, %v771_v36 }
 0x3b6   : > { %v1566_v2 = vadd.f32 %v1561_v55, %v1556_v20 }
 0x3b7   : > { %940 = vrot.lane.b32.xlu0 %v3306_v30, %s4147_s26  ;;  %v807_v8 = vpop.permute.xlu1 %806  ;;  %v791_v0 = vadd.f32 %v787_v1, %v781_v35 }
 0x3b9   : > { %v1571_v31 = vpop.permute.xlu0 %1570  ;;  %v801_v38 = vadd.f32 %v797_v22, %v791_v0 }
 0x3ba   : > { %v1576_v3 = vadd.f32 %v1571_v31, %v1566_v2 }
 0x3bb   : > { %948 = vrot.lane.b32.xlu0 %v3306_v30, %s4148_s29  ;;  %v817_v23 = vpop.permute.xlu1 %816  ;;  %v811_v52 = vadd.f32 %v807_v8, %v801_v38 }
 0x3bd   : > { %v1581_v48 = vpop.permute.xlu0 %1580  ;;  %v821_v9 = vadd.f32 %v817_v23, %v811_v52 }
 0x3be   : > { %v1586_v53 = vadd.f32 %v1581_v48, %v1576_v3 }
 0x3bf   : > { %956 = vrot.lane.b32.xlu0 %v3306_v30, %s4149_s30  ;;  %v827_v60 = vpop.permute.xlu1 %826 }
 0x3c0   : > { %v831_v19 = vadd.f32 %v827_v60, %v821_v9 }
 0x3c1   : > { %v1591_v59 = vpop.permute.xlu0 %1590 }
 0x3c2   : > { %v1596_v62 = vadd.f32 %v1591_v59, %v1586_v53  ;;  %v1311_v53 = vsub.f32 %v2705_v24, %v2971_v40 }
 0x3c3   : > { %964 = vrot.lane.b32.xlu0 %v3306_v30, %s4150_s11  ;;  %v837_v5 = vpop.permute.xlu1 %836 }
 0x3c4   : > { %v841_v21 = vadd.f32 %v837_v5, %v831_v19 }
 0x3c5   : > { %v1601_v27 = vpop.permute.xlu0 %1600 }
 0x3c6   : > { %v1606_v36 = vadd.f32 %v1601_v27, %v1596_v62  ;;  %v1314_v62 = vmul.f32 1.442695, %v1311_v53 }
 0x3c7   : > { %972 = vrot.lane.b32.xlu0 %v3306_v30, %s4151_s13  ;;  %v847_v12 = vpop.permute.xlu1 %846 }
 0x3c8   : > { %v851_v22 = vadd.f32 %v847_v12, %v841_v21 }
 0x3c9   : > { %v1611_v13 = vpop.permute.xlu0 %1610 }
 0x3ca   : > { %v1616_v41 = vadd.f32 %v1611_v13, %v1606_v36 }
 0x3cb   : > { %980 = vrot.lane.b32.xlu0 %v3306_v30, %s4152_s14  ;;  %v857_v57 = vpop.permute.xlu1 %856 }
 0x3cc   : > { %v861_v8 = vadd.f32 %v857_v57, %v851_v22 }
 0x3cd   : > { %v1621_v46 = vpop.permute.xlu0 %1620 }
 0x3ce   : > { %v1626_v1 = vadd.f32 %v1621_v46, %v1616_v41 }
 0x3cf   : > { %988 = vrot.lane.b32.xlu0 %v3306_v30, %s4153_s15  ;;  %v867_v20 = vpop.permute.xlu1 %866 }
 0x3d0   : > { %v871_v23 = vadd.f32 %v867_v20, %v861_v8 }
 0x3d1   : > { %v1631_v31 = vpop.permute.xlu0 %1630 }
 0x3d2   : > { %v1636_v55 = vadd.f32 %v1631_v31, %v1626_v1 }
 0x3d3   : > { %996 = vrot.lane.b32.xlu0 %v3306_v30, %s4154_s16  ;;  %v877_v3 = vpop.permute.xlu1 %876 }
 0x3d4   : > { %v881_v60 = vadd.f32 %v877_v3, %v871_v23 }
 0x3d5   : > { %v1641_v59 = vpop.permute.xlu0 %1640 }
 0x3d6   : > { %v1646_v52 = vadd.f32 %v1641_v59, %v1636_v55 }
 0x3d7   : > { %1004 = vrot.lane.b32.xlu0 %v3306_v30, %s4155_s18  ;;  %v887_v48 = vpop.permute.xlu1 %886 }
 0x3d8   : > { %2535 = vrcp.f32 %v1646_v52  ;;  %v891_v35 = vadd.f32 %v887_v48, %v881_v60 }
 0x3db   : > { %1012 = vrot.lane.b32.xlu0 %v3306_v30, %s4156_s19  ;;  %v897_v12 = vpop.permute.xlu1 %896 }
 0x3dc   : > { %v901_v5 = vadd.f32 %v897_v12, %v891_v35 }
 0x3de   : > { %2537 = vrcp.f32 %v901_v5 }
 0x3df   : > { %1020 = vrot.lane.b32.xlu0 %v3306_v30, %s2593_s10  ;;  %v1503_v27 = vpop.permute.xlu1 %1502  ;;  %2539 = vpow2.f32 %v1314_v62 }
 0x3e2   : > { %v3350_v2 = vpop.eup %2535 }
 0x3e3   : > { %1654 = vrot.lane.b32.xlu0 %v3350_v2, %s2579_s23  ;;  %v1513_v0 = vpop.permute.xlu1 %1512 }
 0x3e7   : > { %1662 = vrot.lane.b32.xlu0 %v3350_v2, %s2580_s24  ;;  %v1523_v38 = vpop.permute.xlu1 %1522 }
 0x3e8   : > { %v3356_v13 = vpop.eup %2537 }
 0x3e9   : > { %910 = vrot.lane.b32.xlu1 %v3356_v13, %s2579_s23  ;;  %v3378_v46 = vpop.eup %2539 }
 0x3ea   : > { %v1507_v19 = vadd.f32 %v3378_v46, %v1503_v27 }
 0x3eb   : > { %1670 = vrot.lane.b32.xlu0 %v3350_v2, %s2581_s25  ;;  %v1533_v57 = vpop.permute.xlu1 %1532 }
 0x3ec   : > { %v1517_v20 = vadd.f32 %v1513_v0, %v1507_v19 }
 0x3ed   : > { %918 = vrot.lane.b32.xlu1 %v3356_v13, %s2580_s24 }
 0x3ee   : > { %v1527_v21 = vadd.f32 %v1523_v38, %v1517_v20 }
 0x3ef   : > { %1678 = vrot.lane.b32.xlu0 %v3350_v2, %s4146_s12  ;;  %v1543_v9 = vpop.permute.xlu1 %1542 }
 0x3f0   : > { %v1537_v31 = vadd.f32 %v1533_v57, %v1527_v21 }
 0x3f1   : > { %926 = vrot.lane.b32.xlu1 %v3356_v13, %s2581_s25 }
 0x3f2   : > { %v1547_v22 = vadd.f32 %v1543_v9, %v1537_v31  ;;  %v3417_v9 = vmul.f32 %v3306_v30, %v3254_v50 }
 0x3f3   : > { %1686 = vrot.lane.b32.xlu0 %v3350_v2, %s4147_s26  ;;  %v1553_v24 = vpop.permute.xlu1 %1552 }
 0x3f4   : > { %v1557_v3 = vadd.f32 %v1553_v24, %v1547_v22 }
 0x3f5   : > { %934 = vrot.lane.b32.xlu1 %v3356_v13, %s4146_s12 }
 0x3f7   : > { %1694 = vrot.lane.b32.xlu0 %v3350_v2, %s4148_s29  ;;  %v1563_v40 = vpop.permute.xlu1 %1562 }
 0x3f8   : > { %v1567_v8 = vadd.f32 %v1563_v40, %v1557_v3  ;;  %v3425_v40 = vmul.f32 %v3350_v2, %v3324_v63 }
 0x3f9   : > { %942 = vrot.lane.b32.xlu1 %v3356_v13, %s4147_s26 }
 0x3fb   : > { %1702 = vrot.lane.b32.xlu0 %v3350_v2, %s4149_s30  ;;  %v1573_v36 = vpop.permute.xlu1 %1572 }
 0x3fc   : > { %v1577_v59 = vadd.f32 %v1573_v36, %v1567_v8 }
 0x3fd   : > { %950 = vrot.lane.b32.xlu1 %v3356_v13, %s4148_s29 }
 0x3ff   : > { %1710 = vrot.lane.b32.xlu0 %v3350_v2, %s4150_s11 }
 0x400   : > { %v1583_v41 = vpop.permute.xlu1 %1582 }
 0x401   : > { %958 = vrot.lane.b32.xlu1 %v3356_v13, %s4149_s30  ;;  %v1587_v23 = vadd.f32 %v1583_v41, %v1577_v59 }
 0x403   : > { %1718 = vrot.lane.b32.xlu0 %v3350_v2, %s4151_s13 }
 0x404   : > { %v1593_v1 = vpop.permute.xlu1 %1592 }
 0x405   : > { %966 = vrot.lane.b32.xlu1 %v3356_v13, %s4150_s11  ;;  %v1597_v48 = vadd.f32 %v1593_v1, %v1587_v23 }
 0x407   : > { %1726 = vrot.lane.b32.xlu0 %v3350_v2, %s4152_s14 }
 0x408   : > { %v1603_v55 = vpop.permute.xlu1 %1602 }
 0x409   : > { %974 = vrot.lane.b32.xlu1 %v3356_v13, %s4151_s13  ;;  %v1607_v35 = vadd.f32 %v1603_v55, %v1597_v48 }
 0x40b   : > { %1734 = vrot.lane.b32.xlu0 %v3350_v2, %s4153_s15 }
 0x40c   : > { %v1613_v52 = vpop.permute.xlu1 %1612 }
 0x40d   : > { %982 = vrot.lane.b32.xlu1 %v3356_v13, %s4152_s14  ;;  %v1617_v12 = vadd.f32 %v1613_v52, %v1607_v35 }
 0x40f   : > { %1742 = vrot.lane.b32.xlu0 %v3350_v2, %s4154_s16 }
 0x410   : > { %v1623_v60 = vpop.permute.xlu1 %1622 }
 0x411   : > { %990 = vrot.lane.b32.xlu1 %v3356_v13, %s4153_s15  ;;  %v1627_v27 = vadd.f32 %v1623_v60, %v1617_v12  ;;  %v3540_v60 = vmul.f32 %v3356_v13, %v3329_v15 }
 0x413   : > { %1750 = vrot.lane.b32.xlu0 %v3350_v2, %s4155_s18 }
 0x414   : > { %v1633_v5 = vpop.permute.xlu1 %1632 }
 0x415   : > { %998 = vrot.lane.b32.xlu1 %v3356_v13, %s4154_s16  ;;  %v1637_v0 = vadd.f32 %v1633_v5, %v1627_v27 }
 0x417   : > { %1758 = vrot.lane.b32.xlu0 %v3350_v2, %s4156_s19 }
 0x418   : > { %v1643_v38 = vpop.permute.xlu1 %1642 }
 0x419   : > { %v1647_v53 = vadd.f32 %v1643_v38, %v1637_v0  ;;  %v909_v57 = vpop.permute.xlu0 %908  ;;  %1006 = vrot.lane.b32.xlu1 %v3356_v13, %s4155_s18 }
 0x41a   : > { %v3434_v30 = vmul.f32 %v2976_v42, %v909_v57 }
 0x41b   : > { %2541 = vrcp.f32 %v1647_v53  ;;  %1766 = vrot.lane.b32.xlu0 %v3350_v2, %s2593_s10 }
 0x41d   : > { %v917_v62 = vpop.permute.xlu0 %916  ;;  %1014 = vrot.lane.b32.xlu1 %v3356_v13, %s4156_s19 }
 0x41e   : > { %v3441_v63 = vmul.f32 %v2983_v47, %v917_v62 }
 0x41f   : > { %1030 = vrot.lane.b32.xlu0 %v3417_v9, %s2594_s20 }
 0x421   : > { %v925_v24 = vpop.permute.xlu0 %924  ;;  %1022 = vrot.lane.b32.xlu1 %v3356_v13, %s2593_s10 }
 0x422   : > { %v3448_v42 = vmul.f32 %v2990_v51, %v925_v24 }
 0x423   : > { %1808 = vrot.lane.b32.xlu0 %v3425_v40, %s2594_s20 }
 0x425   : > { %v3431_v50 = vpop.eup %2541  ;;  %v933_v36 = vpop.permute.xlu0 %932 }
 0x426   : > { %1656 = vrot.lane.b32.xlu1 %v3431_v50, %s2579_s23  ;;  %v3455_v47 = vmul.f32 %v2997_v56, %v933_v36  ;;  %v3551_v5 = vmul.f32 %v3431_v50, %v3378_v46 }
 0x427   : > { %1040 = vrot.lane.b32.xlu0 %v3434_v30, %s2594_s20 }
 0x429   : > { %v941_v2 = vpop.permute.xlu0 %940 }
 0x42a   : > { %1664 = vrot.lane.b32.xlu1 %v3431_v50, %s2580_s24  ;;  %v3462_v51 = vmul.f32 %v3004_v61, %v941_v2 }
 0x42b   : > { %1050 = vrot.lane.b32.xlu0 %v3441_v63, %s2594_s20 }
 0x42d   : > { %v949_v19 = vpop.permute.xlu0 %948 }
 0x42e   : > { %1672 = vrot.lane.b32.xlu1 %v3431_v50, %s2581_s25  ;;  %v3469_v56 = vmul.f32 %v3011_v6, %v949_v19 }
 0x42f   : > { %1060 = vrot.lane.b32.xlu0 %v3448_v42, %s2594_s20 }
 0x431   : > { %v957_v20 = vpop.permute.xlu0 %956 }
 0x432   : > { %1680 = vrot.lane.b32.xlu1 %v3431_v50, %s4146_s12  ;;  %v3476_v61 = vmul.f32 %v3018_v10, %v957_v20 }
 0x433   : > { %1070 = vrot.lane.b32.xlu0 %v3455_v47, %s2594_s20 }
 0x435   : > { %v965_v41 = vpop.permute.xlu0 %964 }
 0x436   : > { %1688 = vrot.lane.b32.xlu1 %v3431_v50, %s4147_s26  ;;  %v3483_v6 = vmul.f32 %v3025_v14, %v965_v41 }
 0x437   : > { %1080 = vrot.lane.b32.xlu0 %v3462_v51, %s2594_s20 }
 0x439   : > { %v973_v21 = vpop.permute.xlu0 %972 }
 0x43a   : > { %1696 = vrot.lane.b32.xlu1 %v3431_v50, %s4148_s29  ;;  %v3490_v10 = vmul.f32 %v3032_v18, %v973_v21 }
 0x43b   : > { %1090 = vrot.lane.b32.xlu0 %v3469_v56, %s2594_s20 }
 0x43d   : > { %v981_v31 = vpop.permute.xlu0 %980 }
 0x43e   : > { %1704 = vrot.lane.b32.xlu1 %v3431_v50, %s4149_s30  ;;  %v3497_v14 = vmul.f32 %v3039_v26, %v981_v31  ;;  %v4158_v31 = vld [vmem:[#allocation3_spill] sm:$0xff] }
 0x43f   : > { %1100 = vrot.lane.b32.xlu0 %v3476_v61, %s2594_s20 }
 0x441   : > { %v989_v1 = vpop.permute.xlu0 %988 }
 0x442   : > { %1712 = vrot.lane.b32.xlu1 %v3431_v50, %s4150_s11  ;;  %v3504_v18 = vmul.f32 %v3046_v32, %v989_v1 }
 0x443   : > { %1110 = vrot.lane.b32.xlu0 %v3483_v6, %s2594_s20 }
 0x445   : > { %v997_v22 = vpop.permute.xlu0 %996 }
 0x446   : > { %1720 = vrot.lane.b32.xlu1 %v3431_v50, %s4151_s13  ;;  %v3511_v26 = vmul.f32 %v3053_v37, %v997_v22 }
 0x447   : > { %1120 = vrot.lane.b32.xlu0 %v3490_v10, %s2594_s20 }
 0x449   : > { %v1005_v3 = vpop.permute.xlu0 %1004 }
 0x44a   : > { %1728 = vrot.lane.b32.xlu1 %v3431_v50, %s4152_s14  ;;  %v3518_v32 = vmul.f32 %v3060_v33, %v1005_v3 }
 0x44b   : > { %1130 = vrot.lane.b32.xlu0 %v3497_v14, %s2594_s20 }
 0x44d   : > { %v1013_v55 = vpop.permute.xlu0 %1012 }
 0x44e   : > { %1736 = vrot.lane.b32.xlu1 %v3431_v50, %s4153_s15  ;;  %v3525_v37 = vmul.f32 %v3067_v45, %v1013_v55  ;;  %v4160_v55 = vld [vmem:[#allocation5_spill] sm:$0xff] }
 0x44f   : > { %1140 = vrot.lane.b32.xlu0 %v3504_v18, %s2594_s20 }
 0x451   : > { %v1021_v8 = vpop.permute.xlu0 %1020 }
 0x452   : > { %1744 = vrot.lane.b32.xlu1 %v3431_v50, %s4154_s16  ;;  %v3532_v33 = vmul.f32 %v3075_v54, %v1021_v8 }
 0x453   : > { %1150 = vrot.lane.b32.xlu0 %v3511_v26, %s2594_s20 }
 0x455   : > { %v1655_v59 = vpop.permute.xlu0 %1654 }
 0x456   : > { %1752 = vrot.lane.b32.xlu1 %v3431_v50, %s4155_s18  ;;  %v3543_v35 = vmul.f32 %v3081_v7, %v1655_v59 }
 0x457   : > { %1160 = vrot.lane.b32.xlu0 %v3518_v32, %s2594_s20 }
 0x459   : > { %v1663_v52 = vpop.permute.xlu0 %1662 }
 0x45a   : > { %1760 = vrot.lane.b32.xlu1 %v3431_v50, %s4156_s19  ;;  %v3554_v27 = vmul.f32 %v3087_v16, %v1663_v52  ;;  %v4161_v52 = vld [vmem:[#allocation6_spill] sm:$0xff] }
 0x45b   : > { %1170 = vrot.lane.b32.xlu0 %v3525_v37, %s2594_s20  ;;  %v911_v23 = vpop.permute.xlu1 %910 }
 0x45c   : > { %v3561_v7 = vmul.f32 %v3092_v25, %v911_v23 }
 0x45d   : > { %v1671_v48 = vpop.permute.xlu0 %1670 }
 0x45e   : > { %1768 = vrot.lane.b32.xlu1 %v3431_v50, %s2593_s10  ;;  %v3564_v0 = vmul.f32 %v3097_v34, %v1671_v48 }
 0x45f   : > { %1180 = vrot.lane.b32.xlu0 %v3532_v33, %s2594_s20  ;;  %v919_v45 = vpop.permute.xlu1 %918 }
 0x460   : > { %v3571_v16 = vmul.f32 %v3102_v28, %v919_v45  ;;  %v4162_v45 = vld [vmem:[#allocation7_spill] sm:$0xff] }
 0x461   : > { %v1679_v12 = vpop.permute.xlu0 %1678 }
 0x462   : > { %1032 = vrot.lane.b32.xlu1 %v3540_v60, %s2594_s20  ;;  %v3574_v53 = vmul.f32 %v3107_v43, %v1679_v12 }
 0x463   : > { %1818 = vrot.lane.b32.xlu0 %v3543_v35, %s2594_s20  ;;  %v927_v54 = vpop.permute.xlu1 %926 }
 0x464   : > { %v3581_v34 = vmul.f32 %v3112_v49, %v927_v54 }
 0x465   : > { %v1687_v15 = vpop.permute.xlu0 %1686 }
 0x466   : > { %1810 = vrot.lane.b32.xlu1 %v3551_v5, %s2594_s20  ;;  %v3584_v62 = vmul.f32 %v3117_v58, %v1687_v15  ;;  %v4163_v15 = vld [vmem:[#allocation8_spill] sm:$0xff] }
 0x467   : > { %1828 = vrot.lane.b32.xlu0 %v3554_v27, %s2594_s20  ;;  %v935_v13 = vpop.permute.xlu1 %934 }
 0x468   : > { %v3591_v43 = vmul.f32 %v3122_v4, %v935_v13 }
 0x469   : > { %v1695_v38 = vpop.permute.xlu0 %1694 }
 0x46a   : > { %1042 = vrot.lane.b32.xlu1 %v3561_v7, %s2594_s20  ;;  %v3594_v50 = vmul.f32 %v3127_v11, %v1695_v38 }
 0x46b   : > { %1838 = vrot.lane.b32.xlu0 %v3564_v0, %s2594_s20  ;;  %v943_v46 = vpop.permute.xlu1 %942 }
 0x46c   : > { %v3601_v58 = vmul.f32 %v3132_v17, %v943_v46  ;;  %v4164_v46 = vld [vmem:[#allocation9_spill] sm:$0xff] }
 0x46d   : > { %v1703_v25 = vpop.permute.xlu0 %1702 }
 0x46e   : > { %1052 = vrot.lane.b32.xlu1 %v3571_v16, %s2594_s20  ;;  %v3604_v2 = vmul.f32 %v3137_v29, %v1703_v25  ;;  %v4157_v29 = vld [vmem:[#allocation2_spill] sm:$0xff] }
 0x46f   : > { %1848 = vrot.lane.b32.xlu0 %v3574_v53, %s2594_s20  ;;  %v951_v57 = vpop.permute.xlu1 %950 }
 0x470   : > { %v3611_v11 = vmul.f32 %v3142_v39, %v951_v57 }
 0x471   : > { %v1711_v28 = vpop.permute.xlu0 %1710 }
 0x472   : > { %1062 = vrot.lane.b32.xlu1 %v3581_v34, %s2594_s20  ;;  %v3614_v20 = vmul.f32 %v3147_v44, %v1711_v28  ;;  %v4159_v44 = vld [vmem:[#allocation4_spill] sm:$0xff]  ;;  %v4165_v28 = vld [vmem:[#allocation10_spill] sm:$0xff] }
 0x473   : > { %1858 = vrot.lane.b32.xlu0 %v3584_v62, %s2594_s20  ;;  %v959_v24 = vpop.permute.xlu1 %958 }
 0x474   : > { %v3621_v41 = vmul.f32 %v4157_v29, %v959_v24  ;;  %v4167_v29 = vld [vmem:[#allocation12_spill] sm:$0xff] }
 0x475   : > { %v1719_v49 = vpop.permute.xlu0 %1718 }
 0x476   : > { %1072 = vrot.lane.b32.xlu1 %v3591_v43, %s2594_s20  ;;  %v3624_v1 = vmul.f32 %v4158_v31, %v1719_v49 }
 0x477   : > { %1868 = vrot.lane.b32.xlu0 %v3594_v50, %s2594_s20  ;;  %v967_v36 = vpop.permute.xlu1 %966 }
 0x478   : > { %v3631_v22 = vmul.f32 %v4159_v44, %v967_v36  ;;  %v4166_v36 = vld [vmem:[#allocation11_spill] sm:$0xff]  ;;  %v4168_v44 = vld [vmem:[#allocation13_spill] sm:$0xff] }
 0x479   : > { %v1727_v4 = vpop.permute.xlu0 %1726 }
 0x47a   : > { %1082 = vrot.lane.b32.xlu1 %v3601_v58, %s2594_s20  ;;  %v3634_v8 = vmul.f32 %v4160_v55, %v1727_v4 }
 0x47b   : > { %1878 = vrot.lane.b32.xlu0 %v3604_v2, %s2594_s20  ;;  %v975_v19 = vpop.permute.xlu1 %974 }
 0x47c   : > { %v3641_v23 = vmul.f32 %v4161_v52, %v975_v19 }
 0x47d   : > { %v1735_v17 = vpop.permute.xlu0 %1734 }
 0x47e   : > { %1092 = vrot.lane.b32.xlu1 %v3611_v11, %s2594_s20  ;;  %v3644_v12 = vmul.f32 %v4162_v45, %v1735_v17  ;;  %v4170_v45 = vld [vmem:[#allocation15_spill] sm:$0xff] }
 0x47f   : > { %1888 = vrot.lane.b32.xlu0 %v3614_v20, %s2594_s20  ;;  %v983_v21 = vpop.permute.xlu1 %982 }
 0x480   : > { %v3651_v13 = vmul.f32 %v4163_v15, %v983_v21 }
 0x481   : > { %v1743_v39 = vpop.permute.xlu0 %1742 }
 0x482   : > { %1102 = vrot.lane.b32.xlu1 %v3621_v41, %s2594_s20  ;;  %v3654_v25 = vmul.f32 %v4164_v46, %v1743_v39  ;;  %v4171_v46 = vld [vmem:[#allocation16_spill] sm:$0xff] }
 0x483   : > { %1898 = vrot.lane.b32.xlu0 %v3624_v1, %s2594_s20  ;;  %v991_v3 = vpop.permute.xlu1 %990 }
 0x484   : > { %v3661_v24 = vmul.f32 %v4165_v28, %v991_v3 }
 0x485   : > { %v1751_v59 = vpop.permute.xlu0 %1750 }
 0x486   : > { %1112 = vrot.lane.b32.xlu1 %v3631_v22, %s2594_s20  ;;  %v3664_v4 = vmul.f32 %v4166_v36, %v1751_v59 }
 0x487   : > { %1908 = vrot.lane.b32.xlu0 %v3634_v8, %s2594_s20  ;;  %v999_v48 = vpop.permute.xlu1 %998 }
 0x488   : > { %v3672_v21 = vmul.f32 %v4167_v29, %v999_v48 }
 0x489   : > { %v1759_v54 = vpop.permute.xlu0 %1758 }
 0x48a   : > { %1122 = vrot.lane.b32.xlu1 %v3641_v23, %s2594_s20  ;;  %v3676_v3 = vmul.f32 %v4168_v44, %v1759_v54 }
 0x48b   : > { %1918 = vrot.lane.b32.xlu0 %v3644_v12, %s2594_s20  ;;  %v1007_v38 = vpop.permute.xlu1 %1006 }
 0x48d   : > { %v1767_v57 = vpop.permute.xlu0 %1766 }
 0x48e   : > { %1132 = vrot.lane.b32.xlu1 %v3651_v13, %s2594_s20  ;;  %v3688_v15 = vmul.f32 %v4170_v45, %v1767_v57 }
 0x48f   : > { %1928 = vrot.lane.b32.xlu0 %v3654_v25, %s2594_s20  ;;  %v1015_v49 = vpop.permute.xlu1 %1014 }
 0x490   : > { %v3696_v28 = vmul.f32 %v4171_v46, %v1015_v49  ;;  %v4174_v49 = vld [vmem:[#allocation18_spill] sm:$0xff] }
 0x491   : > { %v1031_v19 = vpop.permute.xlu0 %1030 }
 0x492   : > { %1142 = vrot.lane.b32.xlu1 %v3661_v24, %s2594_s20  ;;  %v1036_v17 = vadd.f32 %v1031_v19, %v3417_v9  ;;  %v4169_v9 = vld [vmem:[#allocation14_spill] sm:$0xff] }
 0x493   : > { %1938 = vrot.lane.b32.xlu0 %v3664_v4, %s2594_s20  ;;  %v1023_v31 = vpop.permute.xlu1 %1022  ;;  %v3685_v52 = vmul.f32 %v4169_v9, %v1007_v38 }
 0x494   : > { %v1774_v39 = vadd.f32 %v3425_v40, %v1036_v17  ;;  %v4172_v17 = vld [vmem:[#allocation17_spill] sm:$0xff] }
 0x495   : > { %v1809_v55 = vpop.permute.xlu0 %1808  ;;  %v3705_v29 = vmul.f32 %v4172_v17, %v1023_v31  ;;  %v4175_v31 = vld [vmem:[#allocation19_spill] sm:$0xff] }
 0x496   : > { %1152 = vrot.lane.b32.xlu1 %v3672_v21, %s2594_s20  ;;  %v3680_v59 = vadd.f32 %v1809_v55, %v1774_v39 }
 0x497   : > { %1948 = vrot.lane.b32.xlu0 %v3676_v3, %s2594_s20  ;;  %4173 = vst [vmem:[#allocation2_spill] sm:$0xff] %v3705_v29 }
 0x498   : > { %v1657_v48 = vpop.permute.xlu1 %1656 }
 0x499   : > { %v1041_v40 = vpop.permute.xlu0 %1040  ;;  %v3714_v55 = vmul.f32 %v4174_v49, %v1657_v48  ;;  %v4176_v48 = vld [vmem:[#allocation20_spill] sm:$0xff] }
 0x49a   : > { %1162 = vrot.lane.b32.xlu1 %v3685_v52, %s2594_s20  ;;  %v1046_v54 = vadd.f32 %v1041_v40, %v3434_v30 }
 0x49b   : > { %1958 = vrot.lane.b32.xlu0 %v3688_v15, %s2594_s20 }
 0x49c   : > { %v1665_v36 = vpop.permute.xlu1 %1664  ;;  %v3699_v38 = vadd.f32 %v3543_v35, %v1046_v54 }
 0x49d   : > { %v1051_v19 = vpop.permute.xlu0 %1050  ;;  %v3723_v40 = vmul.f32 %v4175_v31, %v1665_v36  ;;  %v4177_v36 = vld [vmem:[#allocation21_spill] sm:$0xff] }
 0x49e   : > { %1172 = vrot.lane.b32.xlu1 %v3696_v28, %s2594_s20  ;;  %v1056_v57 = vadd.f32 %v1051_v19, %v3441_v63 }
 0x4a0   : > { %v1673_v30 = vpop.permute.xlu1 %1672  ;;  %v3708_v39 = vadd.f32 %v3554_v27, %v1056_v57 }
 0x4a1   : > { %v1061_v44 = vpop.permute.xlu0 %1060  ;;  %v3732_v19 = vmul.f32 %v4176_v48, %v1673_v30  ;;  %v4178_v30 = vld [vmem:[#allocation22_spill] sm:$0xff] }
 0x4a2   : > { %1182 = vrot.lane.b32.xlu1 %v3705_v29, %s2594_s20  ;;  %v1066_v35 = vadd.f32 %v1061_v44, %v3448_v42 }
 0x4a4   : > { %v1681_v9 = vpop.permute.xlu1 %1680  ;;  %v3717_v45 = vadd.f32 %v3564_v0, %v1066_v35 }
 0x4a5   : > { %v1071_v63 = vpop.permute.xlu0 %1070  ;;  %v3741_v44 = vmul.f32 %v4177_v36, %v1681_v9  ;;  %v4179_v9 = vld [vmem:[#allocation23_spill] sm:$0xff] }
 0x4a6   : > { %1820 = vrot.lane.b32.xlu1 %v3714_v55, %s2594_s20  ;;  %v1076_v27 = vadd.f32 %v1071_v63, %v3455_v47 }
 0x4a8   : > { %v1689_v54 = vpop.permute.xlu1 %1688  ;;  %v3726_v46 = vadd.f32 %v3574_v53, %v1076_v27 }
 0x4a9   : > { %v1081_v42 = vpop.permute.xlu0 %1080  ;;  %v3750_v63 = vmul.f32 %v4178_v30, %v1689_v54  ;;  %v4180_v54 = vld [vmem:[#allocation24_spill] sm:$0xff] }
 0x4aa   : > { %1830 = vrot.lane.b32.xlu1 %v3723_v40, %s2594_s20  ;;  %v1086_v0 = vadd.f32 %v1081_v42, %v3462_v51 }
 0x4ac   : > { %v1697_v57 = vpop.permute.xlu1 %1696  ;;  %v3735_v17 = vadd.f32 %v3584_v62, %v1086_v0 }
 0x4ad   : > { %v1091_v47 = vpop.permute.xlu0 %1090  ;;  %v3759_v42 = vmul.f32 %v4179_v9, %v1697_v57  ;;  %v4181_v57 = vld [vmem:[#allocation25_spill] sm:$0xff] }
 0x4ae   : > { %1840 = vrot.lane.b32.xlu1 %v3732_v19, %s2594_s20  ;;  %v1096_v53 = vadd.f32 %v1091_v47, %v3469_v56 }
 0x4b0   : > { %v1705_v35 = vpop.permute.xlu1 %1704  ;;  %v3744_v49 = vadd.f32 %v3594_v50, %v1096_v53 }
 0x4b1   : > { %v1101_v51 = vpop.permute.xlu0 %1100  ;;  %v3768_v47 = vmul.f32 %v4180_v54, %v1705_v35  ;;  %v4182_v35 = vld [vmem:[#allocation26_spill] sm:$0xff] }
 0x4b2   : > { %1850 = vrot.lane.b32.xlu1 %v3741_v44, %s2594_s20  ;;  %v1106_v62 = vadd.f32 %v1101_v51, %v3476_v61 }
 0x4b4   : > { %v1713_v27 = vpop.permute.xlu1 %1712  ;;  %v3753_v31 = vadd.f32 %v3604_v2, %v1106_v62 }
 0x4b5   : > { %v1111_v56 = vpop.permute.xlu0 %1110  ;;  %v3777_v51 = vmul.f32 %v4181_v57, %v1713_v27  ;;  %v4183_v27 = vld [vmem:[#allocation27_spill] sm:$0xff] }
 0x4b6   : > { %1860 = vrot.lane.b32.xlu1 %v3750_v63, %s2594_s20  ;;  %v1116_v50 = vadd.f32 %v1111_v56, %v3483_v6 }
 0x4b8   : > { %v1721_v0 = vpop.permute.xlu1 %1720  ;;  %v3762_v48 = vadd.f32 %v3614_v20, %v1116_v50 }
 0x4b9   : > { %v1121_v61 = vpop.permute.xlu0 %1120  ;;  %v3786_v56 = vmul.f32 %v4182_v35, %v1721_v0 }
 0x4ba   : > { %1870 = vrot.lane.b32.xlu1 %v3759_v42, %s2594_s20  ;;  %v1126_v2 = vadd.f32 %v1121_v61, %v3490_v10 }
 0x4bc   : > { %v1729_v53 = vpop.permute.xlu1 %1728  ;;  %v3771_v36 = vadd.f32 %v3624_v1, %v1126_v2 }
 0x4bd   : > { %v1131_v6 = vpop.permute.xlu0 %1130  ;;  %v3795_v61 = vmul.f32 %v4183_v27, %v1729_v53  ;;  %v4187_v27 = vld [vmem:[#allocation31_spill] sm:$0xff] }
 0x4be   : > { %1880 = vrot.lane.b32.xlu1 %v3768_v47, %s2594_s20  ;;  %v1136_v20 = vadd.f32 %v1131_v6, %v3497_v14 }
 0x4c0   : > { %v1737_v62 = vpop.permute.xlu1 %1736  ;;  %v3780_v30 = vadd.f32 %v3634_v8, %v1136_v20 }
 0x4c1   : > { %v1141_v10 = vpop.permute.xlu0 %1140 }
 0x4c2   : > { %1890 = vrot.lane.b32.xlu1 %v3777_v51, %s2594_s20  ;;  %v1146_v1 = vadd.f32 %v1141_v10, %v3504_v18  ;;  %v4186_v10 = vld [vmem:[#allocation30_spill] sm:$0xff] }
 0x4c4   : > { %v1745_v50 = vpop.permute.xlu1 %1744  ;;  %v3789_v9 = vadd.f32 %v3644_v12, %v1146_v1  ;;  %v4184_v12 = vld [vmem:[#allocation28_spill] sm:$0xff] }
 0x4c5   : > { %v1151_v14 = vpop.permute.xlu0 %1150  ;;  %v3805_v0 = vmul.f32 %v4184_v12, %v1737_v62 }
 0x4c6   : > { %1900 = vrot.lane.b32.xlu1 %v3786_v56, %s2594_s20  ;;  %v1156_v8 = vadd.f32 %v1151_v14, %v3511_v26  ;;  %v4185_v26 = vld [vmem:[#allocation29_spill] sm:$0xff] }
 0x4c7   : > { %v3812_v53 = vmul.f32 %v4185_v26, %v1745_v50 }
 0x4c8   : > { %v1753_v2 = vpop.permute.xlu1 %1752  ;;  %v3798_v54 = vadd.f32 %v3654_v25, %v1156_v8 }
 0x4c9   : > { %v3800_v18 = vpop.permute.xlu0 %1160  ;;  %v3819_v1 = vmul.f32 %v4186_v10, %v1753_v2 }
 0x4ca   : > { %1910 = vrot.lane.b32.xlu1 %v3795_v61, %s2594_s20 }
 0x4cc   : > { %v1761_v6 = vpop.permute.xlu1 %1760 }
 0x4cd   : > { %v3807_v20 = vpop.permute.xlu0 %1170  ;;  %v3827_v12 = vmul.f32 %v4187_v27, %v1761_v6 }
 0x4ce   : > { %1920 = vrot.lane.b32.xlu1 %v3805_v0, %s2594_s20 }
 0x4d0   : > { %v1769_v57 = vpop.permute.xlu1 %1768 }
 0x4d1   : > { %v3814_v25 = vpop.permute.xlu0 %1180 }
 0x4d2   : > { %1930 = vrot.lane.b32.xlu1 %v3812_v53, %s2594_s20 }
 0x4d4   : > { %v1033_v62 = vpop.permute.xlu1 %1032 }
 0x4d5   : > { %v1037_v35 = vadd.f32 %v1033_v62, %v3540_v60  ;;  %v1819_v14 = vpop.permute.xlu0 %1818  ;;  %v4188_v62 = vld [vmem:[#allocation32_spill] sm:$0xff] }
 0x4d6   : > { %1940 = vrot.lane.b32.xlu1 %v3819_v1, %s2594_s20  ;;  %v1824_v8 = vadd.f32 %v1819_v14, %v3699_v38  ;;  %v3837_v38 = vmul.f32 %v4188_v62, %v1769_v57 }
 0x4d7   : > { %v1775_v50 = vadd.f32 %v3551_v5, %v1037_v35 }
 0x4d8   : > { %v1811_v26 = vpop.permute.xlu1 %1810  ;;  %v1966_v29 = vsel %vm321_vm2, %v3680_v59, %v1824_v8 }
 0x4d9   : > { %v3831_v2 = vadd.f32 %v1811_v26, %v1775_v50  ;;  %v1829_v10 = vpop.permute.xlu0 %1828 }
 0x4da   : > { %1950 = vrot.lane.b32.xlu1 %v3827_v12, %s2594_s20  ;;  %v1834_v60 = vadd.f32 %v1829_v10, %v3708_v39 }
 0x4dc   : > { %v1043_v5 = vpop.permute.xlu1 %1042  ;;  %v1969_v6 = vsel %vm1968_vm4, %v1966_v29, %v1834_v60 }
 0x4dd   : > { %v1047_v35 = vadd.f32 %v1043_v5, %v3561_v7  ;;  %v1839_v14 = vpop.permute.xlu0 %1838 }
 0x4de   : > { %1960 = vrot.lane.b32.xlu1 %v3837_v38, %s2594_s20  ;;  %v1844_v59 = vadd.f32 %v1839_v14, %v3717_v45 }
 0x4df   : > { %v3845_v8 = vadd.f32 %v3714_v55, %v1047_v35 }
 0x4e0   : > { %v1053_v50 = vpop.permute.xlu1 %1052  ;;  %v1972_v39 = vsel %vm1971_vm5, %v1969_v6, %v1844_v59 }
 0x4e1   : > { %v1057_v57 = vadd.f32 %v1053_v50, %v3571_v16  ;;  %v1849_v27 = vpop.permute.xlu0 %1848 }
 0x4e2   : > { %v1854_v29 = vadd.f32 %v1849_v27, %v3726_v46 }
 0x4e3   : > { %v3851_v7 = vadd.f32 %v3723_v40, %v1057_v57 }
 0x4e4   : > { %v1063_v26 = vpop.permute.xlu1 %1062  ;;  %v1975_v10 = vsel %vm1974_vm6, %v1972_v39, %v1854_v29 }
 0x4e5   : > { %v1067_v45 = vadd.f32 %v1063_v26, %v3581_v34  ;;  %v1859_v55 = vpop.permute.xlu0 %1858 }
 0x4e6   : > { %v1864_v60 = vadd.f32 %v1859_v55, %v3735_v17 }
 0x4e7   : > { %v3857_v62 = vadd.f32 %v3732_v19, %v1067_v45 }
 0x4e8   : > { %v1073_v16 = vpop.permute.xlu1 %1072  ;;  %v1978_v5 = vsel %vm1977_vm7, %v1975_v10, %v1864_v60 }
 0x4e9   : > { %v1077_v46 = vadd.f32 %v1073_v16, %v3591_v43  ;;  %v1869_v40 = vpop.permute.xlu0 %1868 }
 0x4ea   : > { %v1874_v6 = vadd.f32 %v1869_v40, %v3744_v49  ;;  %v1166_v40 = vadd.f32 %v3800_v18, %v3518_v32 }
 0x4eb   : > { %v3863_v35 = vadd.f32 %v3741_v44, %v1077_v46 }
 0x4ec   : > { %v1083_v34 = vpop.permute.xlu1 %1082  ;;  %v1981_v14 = vsel %vm1980_vm8, %v1978_v5, %v1874_v6 }
 0x4ed   : > { %v1087_v17 = vadd.f32 %v1083_v34, %v3601_v58  ;;  %v1879_v19 = vpop.permute.xlu0 %1878 }
 0x4ee   : > { %v1884_v59 = vadd.f32 %v1879_v19, %v3753_v31 }
 0x4ef   : > { %v3869_v50 = vadd.f32 %v3750_v63, %v1087_v17  ;;  %v1800_v17 = vadd.f32 %v3664_v4, %v1166_v40 }
 0x4f0   : > { %v1093_v43 = vpop.permute.xlu1 %1092  ;;  %v1984_v39 = vsel %vm1983_vm9, %v1981_v14, %v1884_v59 }
 0x4f1   : > { %v1097_v49 = vadd.f32 %v1093_v43, %v3611_v11  ;;  %v1889_v57 = vpop.permute.xlu0 %1888 }
 0x4f2   : > { %v1894_v44 = vadd.f32 %v1889_v57, %v3762_v48  ;;  %v2401_v57 = vld [vmem:[%s4019_s6 + $0x10] sm:$0xff]  }
 0x4f3   : > { %v3875_v27 = vadd.f32 %v3759_v42, %v1097_v49  ;;  %v4189_v49 = vmov 0.0  }
 0x4f4   : > { %v1103_v29 = vpop.permute.xlu1 %1102  ;;  %v1986_v58 = vsel %vm395_vm3, %v1984_v39, %v1894_v44 }
 0x4f5   : > { %v1107_v26 = vadd.f32 %v1103_v29, %v3621_v41  ;;  %v1899_v31 = vpop.permute.xlu0 %1898 }
 0x4f6   : > { %v1904_v63 = vadd.f32 %v1899_v31, %v3771_v36  ;;  %v2403_v31 = vld [vmem:[%s4019_s6 + $0x20] sm:$0xff]  }
 0x4f7   : > { %v3881_v10 = vadd.f32 %v3768_v47, %v1107_v26 }
 0x4f8   : > { %v1113_v45 = vpop.permute.xlu1 %1112  ;;  %v1989_v11 = vsel %vm1988_vm10, %v1986_v58, %v1904_v63 }
 0x4f9   : > { %v1117_v48 = vadd.f32 %v1113_v45, %v3631_v22  ;;  %v1909_v42 = vpop.permute.xlu0 %1908 }
 0x4fa   : > { %v1914_v55 = vadd.f32 %v1909_v42, %v3780_v30 }
 0x4fb   : > { %v3887_v60 = vadd.f32 %v3777_v51, %v1117_v48 }
 0x4fc   : > { %v1123_v41 = vpop.permute.xlu1 %1122  ;;  %v1992_v16 = vsel %vm1991_vm11, %v1989_v11, %v1914_v55  ;;  %v2404_v11 = vld [vmem:[%s4019_s6 + $0x28] sm:$0xff]  }
 0x4fd   : > { %v1127_v36 = vadd.f32 %v1123_v41, %v3641_v23  ;;  %v1919_v47 = vpop.permute.xlu0 %1918  ;;  %v2405_v41 = vld [vmem:[%s4019_s6 + $0x30] sm:$0xff]  }
 0x4fe   : > { %v1924_v5 = vadd.f32 %v1919_v47, %v3789_v9 }
 0x4ff   : > { %v3893_v46 = vadd.f32 %v3786_v56, %v1127_v36  ;;  %v1176_v56 = vadd.f32 %v3807_v20, %v3525_v37  ;;  %v1186_v37 = vadd.f32 %v3814_v25, %v3532_v33 }
 0x500   : > { %v1133_v22 = vpop.permute.xlu1 %1132  ;;  %v1995_v30 = vsel %vm1994_vm12, %v1992_v16, %v1924_v5 }
 0x501   : > { %v1137_v51 = vadd.f32 %v1133_v22, %v3651_v13  ;;  %v1929_v6 = vpop.permute.xlu0 %1928  ;;  %v1802_v4 = vadd.f32 %v3676_v3, %v1176_v56  ;;  %v1804_v3 = vadd.f32 %v3688_v15, %v1186_v37  ;;  %v2402_v15 = vld [vmem:[%s4019_s6 + $0x18] sm:$0xff]  }
 0x502   : > { %v1934_v34 = vadd.f32 %v1929_v6, %v3798_v54 }
 0x503   : > { %v3901_v23 = vadd.f32 %v3795_v61, %v1137_v51  ;;  %v2399_v61 = vld [vmem:[%s4019_s6] sm:$0xff]  }
 0x504   : > { %v1143_v14 = vpop.permute.xlu1 %1142  ;;  %v1998_v9 = vsel %vm1997_vm13, %v1995_v30, %v1934_v34  ;;  %2326 = vmatpush3.bf16.msra.mxu0 %v2399_v61 }
 0x505   : > { %v1147_v32 = vadd.f32 %v1143_v14, %v3661_v24  ;;  %v1939_v18 = vpop.permute.xlu0 %1938  ;;  %2327 = vmatprep.subr.bf16.mxu0 %v4189_v49 }
 0x506   : > { %v1944_v13 = vadd.f32 %v1939_v18, %v1800_v17 }
 0x507   : > { %v3909_v19 = vadd.f32 %v3805_v0, %v1147_v32  ;;  %v2400_v0 = vld [vmem:[%s4019_s6 + $0x8] sm:$0xff]  }
 0x508   : > { %v1153_v54 = vpop.permute.xlu1 %1152  ;;  %v2001_v20 = vsel %vm2000_vm14, %v1998_v9, %v1944_v13  ;;  %2328 = vmatpush3.bf16.msra.mxu0 %v2400_v0 }
 0x509   : > { %v1157_v24 = vadd.f32 %v1153_v54, %v3672_v21  ;;  %v1949_v59 = vpop.permute.xlu0 %1948  ;;  %2329 = vmatprep.subr.bf16.mxu0 %v4189_v49 }
 0x50a   : > { %v1954_v43 = vadd.f32 %v1949_v59, %v1802_v4 }
 0x50b   : > { %v3923_v39 = vadd.f32 %v3812_v53, %v1157_v24 }
 0x50c   : > { %v1163_v33 = vpop.permute.xlu1 %1162  ;;  %v2004_v25 = vsel %vm2003_vm15, %v2001_v20, %v1954_v43  ;;  %2330 = vmatpush3.bf16.msra.mxu0 %v2401_v57  ;;  %v2406_v43 = vld [vmem:[%s4019_s6 + $0x38] sm:$0xff]  }
 0x50d   : > { %v1959_v21 = vpop.permute.xlu0 %1958  ;;  %2331 = vmatprep.subr.bf16.mxu0 %v4189_v49  ;;  %v1167_v37 = vadd.f32 %v1163_v33, %v3685_v52 }
 0x50e   : > { %v1964_v44 = vadd.f32 %v1959_v21, %v1804_v3 }
 0x50f   : > { %v1801_v59 = vadd.f32 %v3819_v1, %v1167_v37 }
 0x510   : > { %v1173_v29 = vpop.permute.xlu1 %1172  ;;  %v2007_v53 = vsel %vm2006_vm0, %v2004_v25, %v1964_v44  ;;  %2332 = vmatpush3.bf16.msra.mxu0 %v2402_v15 }
 0x511   : > { %v3933_v58 = vmul.f32 0.25, %v2007_v53  ;;  %2333 = vmatprep.subr.bf16.mxu0 %v4189_v49  ;;  %v1177_v24 = vadd.f32 %v1173_v29, %v3696_v28  ;;  %v2172_v28 = vpop.f32.mrb[8].mxu1 }
 0x512   : > { %v2349_v21 = vpop.f32.mrb[9].mxu1 }
 0x513   : > { %2013 = vrot.lane.b32.xlu0 %v3933_v58, %s2594_s20  ;;  %v1803_v33 = vadd.f32 %v3827_v12, %v1177_v24  ;;  %v2175_v44 = vpop.f32.mrb[10].mxu1  ;;  %v2303_v12 = vld [vmem:[%s4017_s4] sm:$0xff]  }
 0x514   : > { %v1183_v26 = vpop.permute.xlu1 %1182  ;;  %2334 = vmatpush3.bf16.msra.mxu0 %v2403_v31  ;;  %v2350_v53 = vpop.f32.mrb[11].mxu1 }
 0x515   : > { %2335 = vmatprep.subr.bf16.mxu0 %v4189_v49 }
 0x518   : > { %v1821_v63 = vpop.permute.xlu1 %1820  ;;  %2336 = vmatpush3.bf16.msra.mxu0 %v2404_v11 }
 0x519   : > { %v1825_v45 = vadd.f32 %v1821_v63, %v3845_v8  ;;  %2337 = vmatprep.subr.bf16.mxu0 %v4189_v49  ;;  %v2304_v63 = vunpack.c.l.bf16 %v2303_v12 }
 0x51b   : > { %v1967_v48 = vsel %vm321_vm2, %v3831_v2, %v1825_v45  ;;  %v2305_v45 = vunpack.c.h.bf16 %v2303_v12 }
 0x51c   : > { %v1831_v42 = vpop.permute.xlu1 %1830  ;;  %2338 = vmatpush3.bf16.msra.mxu0 %v2405_v41 }
 0x51d   : > { %v1835_v55 = vadd.f32 %v1831_v42, %v3851_v7  ;;  %2339 = vmatprep.subr.bf16.mxu0 %v4189_v49 }
 0x51f   : > { %v1970_v8 = vsel %vm1968_vm4, %v1967_v48, %v1835_v55 }
 0x520   : > { %v1841_v16 = vpop.permute.xlu1 %1840  ;;  %2340 = vmatpush3.bf16.msra.mxu0 %v2406_v43 }
 0x521   : > { %v1845_v36 = vadd.f32 %v1841_v16, %v3857_v62  ;;  %v2297_v16 = vld [vmem:[%s4020_s7] ss:$0 sm:$0xff] }
 0x523   : > { %v1973_v2 = vsel %vm1971_vm5, %v1970_v8, %v1845_v36 }
 0x524   : > { %v1851_v47 = vpop.permute.xlu1 %1850 }
 0x525   : > { %v1855_v7 = vadd.f32 %v1851_v47, %v3863_v35 }
 0x527   : > { %v1976_v5 = vsel %vm1974_vm6, %v1973_v2, %v1855_v7 }
 0x528   : > { %v1861_v22 = vpop.permute.xlu1 %1860 }
 0x529   : > { %v1865_v40 = vadd.f32 %v1861_v22, %v3869_v50 }
 0x52b   : > { %v1979_v30 = vsel %vm1977_vm7, %v1976_v5, %v1865_v40 }
 0x52c   : > { %v1871_v51 = vpop.permute.xlu1 %1870 }
 0x52d   : > { %v1875_v6 = vadd.f32 %v1871_v51, %v3875_v27 }
 0x52f   : > { %v1982_v62 = vsel %vm1980_vm8, %v1979_v30, %v1875_v6 }
 0x530   : > { %v1881_v34 = vpop.permute.xlu1 %1880 }
 0x531   : > { %v1885_v14 = vadd.f32 %v1881_v34, %v3881_v10 }
 0x533   : > { %v1985_v56 = vsel %vm1983_vm9, %v1982_v62, %v1885_v14 }
 0x534   : > { %v1891_v9 = vpop.permute.xlu1 %1890 }
 0x535   : > { %v1895_v35 = vadd.f32 %v1891_v9, %v3887_v60 }
 0x537   : > { %v1987_v17 = vsel %vm395_vm3, %v1985_v56, %v1895_v35 }
 0x538   : > { %v1901_v32 = vpop.permute.xlu1 %1900 }
 0x539   : > { %v1905_v50 = vadd.f32 %v1901_v32, %v3893_v46 }
 0x53b   : > { %v1990_v18 = vsel %vm1988_vm10, %v1987_v17, %v1905_v50 }
 0x53c   : > { %v1911_v13 = vpop.permute.xlu1 %1910 }
 0x53d   : > { %v1915_v27 = vadd.f32 %v1911_v13, %v3901_v23 }
 0x53f   : > { %v1993_v54 = vsel %vm1991_vm11, %v1990_v18, %v1915_v27  ;;  %v2551_v18 = vld [vmem:[%s2672_s17] sm:$0xff] }
 0x540   : > { %v1921_v61 = vpop.permute.xlu1 %1920 }
 0x541   : > { %v1925_v10 = vadd.f32 %v1921_v61, %v3909_v19  ;;  %v4190_v19 = vld [vmem:[#allocation2_spill] sm:$0xff] }
 0x542   : > { %v1187_v49 = vadd.f32 %v1183_v26, %v4190_v19 }
 0x543   : > { %v1996_v20 = vsel %vm1994_vm12, %v1993_v54, %v1925_v10  ;;  %v2552_v54 = vld [vmem:[%s2672_s17 + $0x8] sm:$0xff] }
 0x544   : > { %v1931_v60 = vpop.permute.xlu1 %1930  ;;  %v1805_v1 = vadd.f32 %v3837_v38, %v1187_v49 }
 0x545   : > { %v1935_v4 = vadd.f32 %v1931_v60, %v3923_v39 }
 0x547   : > { %v1999_v46 = vsel %vm1997_vm13, %v1996_v20, %v1935_v4 }
 0x548   : > { %v1941_v0 = vpop.permute.xlu1 %1940 }
 0x549   : > { %v1945_v23 = vadd.f32 %v1941_v0, %v1801_v59 }
 0x54b   : > { %v2002_v52 = vsel %vm2000_vm14, %v1999_v46, %v1945_v23 }
 0x54c   : > { %v1951_v39 = vpop.permute.xlu1 %1950 }
 0x54d   : > { %v1955_v25 = vadd.f32 %v1951_v39, %v1803_v33 }
 0x54f   : > { %v2005_v3 = vsel %vm2003_vm15, %v2002_v52, %v1955_v25 }
 0x550   : > { %v1961_v57 = vpop.permute.xlu1 %1960 }
 0x551   : > { %v1965_v29 = vadd.f32 %v1961_v57, %v1805_v1 }
 0x553   : > { %v2008_v15 = vsel %vm2006_vm0, %v2005_v3, %v1965_v29 }
 0x554   : > { %v2010_v26 = vmul.f32 0.25, %v2008_v15 }
 0x556   : > { %2015 = vrot.lane.b32.xlu1 %v2010_v26, %s2594_s20  ;;  %s4191_s20 = sshll.u32 %s4193_s9, 3 }
 0x557   : > { %s307_s25 = scalar_lea.vmem %s4021_s8, %s4191_s20 }
 0x585   : > { %v2014_v31 = vpop.permute.xlu0 %2013 }
 0x586   : > { %v2020_v38 = vsel %vm2019_vm1, %v3933_v58, %v2014_v31 }
 0x587   : > { %v2026_v42 = vmul.f32 %v2304_v63, %v2020_v38 }
 0x5c8   : > { %v2016_v11 = vpop.permute.xlu1 %2015 }
 0x5c9   : > { %v2021_v48 = vsel %vm2019_vm1, %v2010_v26, %v2016_v11 }
 0x5ca   : > { %v2027_v55 = vmul.f32 %v2305_v45, %v2021_v48 }
 0x5cc   : > { %v2029_v41 = vpack.c.bf16 %v2027_v55, %v2026_v42 }
 0x5ce   : > { %2342 = vmatmul.mubr.bf16.vlgmr.msra.gmra.mrb[0].mxu0 %v2029_v41 }
 0x6a1   : > { %v2128_v8 = vpop.f32.mrb[0].mxu0 }
 0x6a2   : > { %v2173_v36 = vadd.f32 %v2172_v28, %v2128_v8  ;;  %v2343_v2 = vpop.f32.mrb[1].mxu0 }
 0x6a3   : > { %v2131_v47 = vpop.f32.mrb[2].mxu0 }
 0x6a4   : > { %v2186_v7 = vadd.f32 %v2297_v16, %v2173_v36  ;;  %v2176_v5 = vadd.f32 %v2175_v44, %v2131_v47  ;;  %v2344_v22 = vpop.f32.mrb[3].mxu0 }
 0x6a6   : > { %v2298_v40 = vmul.f32 -1.442695, %v2186_v7  ;;  %v2187_v30 = vadd.f32 %v2297_v16, %v2176_v5 }
 0x6a8   : > { %2543 = vpow2.f32 %v2298_v40  ;;  %v2299_v58 = vmul.f32 -1.442695, %v2187_v30 }
 0x6aa   : > { %2545 = vpow2.f32 %v2299_v58 }
 0x6b2   : > { %v2544_v51 = vpop.eup %2543 }
 0x6b3   : > { %v2194_v6 = vadd.f32 1.0, %v2544_v51 }
 0x6b4   : > { %v2546_v62 = vpop.eup %2545 }
 0x6b5   : > { %2547 = vrcp.f32 %v2194_v6  ;;  %v2195_v34 = vadd.f32 1.0, %v2546_v62 }
 0x6b7   : > { %2549 = vrcp.f32 %v2195_v34 }
 0x6bf   : > { %v2548_v14 = vpop.eup %2547 }
 0x6c0   : > { %v2200_v56 = vmul.f32 %v2548_v14, %v2186_v7 }
 0x6c1   : > { %v2550_v9 = vpop.eup %2549 }
 0x6c2   : > { %v2201_v35 = vmul.f32 %v2550_v9, %v2187_v30  ;;  %2204 = vrot.lane.b32.xlu0 %v2200_v56, %s2565_s28 }
 0x6c4   : > { %2206 = vrot.lane.b32.xlu1 %v2201_v35, %s2565_s28 }
 0x734   : > { %v2205_v17 = vpop.permute.xlu0 %2204 }
 0x735   : > { %v2210_v32 = vmul.f32 %v2548_v14, %v2205_v17 }
 0x736   : > { %v2207_v50 = vpop.permute.xlu1 %2206 }
 0x737   : > { %v2212_v13 = vadd.f32 %v2551_v18, %v2210_v32  ;;  %v2211_v27 = vmul.f32 %v2550_v9, %v2207_v50 }
 0x739   : > { %2214 = vst.msk [vmem:[%s307_s25] sm:$0xff] %vm321_vm2, %v2212_v13  ;;  %v2213_v61 = vadd.f32 %v2552_v54, %v2211_v27 }
 0x73b   : > { %2215 = vst.msk [vmem:[%s307_s25 + $0x8] sm:$0xff] %vm321_vm2, %v2213_v61 }
 0x73c PF: > { %s18_s27 = sadd.s32 1, %s2559_s27  }
 0x73d   : > { %p15_p4 = scmp.ge.s32.totalorder %s18_s27, 4  }
 0x73f   :  { %17 = sbr.rel (!%p15_p4) target bundleno = 1 (0x1), region = 82 }

</bundles_post_ra>
